<compile_context>
chip_gen: v7x
topology: tpu7x:2x2x1
jax: 0.10.0
libtpu: 0.0.40
codegen_flags: <defaults>
</compile_context>

<pallas_src>
import functools
from math import sqrt

import jax
import jax.numpy as jnp
from jax.experimental import pallas as pl
from jax.experimental.pallas import tpu as pltpu


def _round_up(x, m):
    return (x + m - 1) // m * m


# ---------------------------------------------------------------------------
# Kernel
# ---------------------------------------------------------------------------
def _tree_lstm_kernel(x_ref, h_ref, c_ref, wx_ref, wh_ref, b_ref,
                      h_out_ref, c_out_ref, *, hidden_dim, n_ary):
    H, N = hidden_dim, n_ary
    NH = N * H

    wx = wx_ref[...]
    wh = wh_ref[...]
    mm_dtype = wx.dtype

    # Fused pre-activations for all gates, packed [f_0..f_{N-1} | i | o | u].
    # Two resident-weight MXU dots (x@Wx + h@Wh), f32 accumulation, one f32
    # bias add (all four Linear biases pre-folded).
    z = jnp.dot(x_ref[...].astype(mm_dtype), wx,
                preferred_element_type=jnp.float32)
    z = z + jnp.dot(h_ref[...].astype(mm_dtype), wh,
                    preferred_element_type=jnp.float32)
    z = z + b_ref[...]

    # One dense EUP pass for every sigmoid gate (f_0..f_{N-1}, i, o) and one
    # tanh pass for u — no zero-padded lanes.
    sig = jax.nn.sigmoid(z[:, :NH + 2 * H])
    u_g = jnp.tanh(z[:, NH + 2 * H:])

    # f * c: lane-aligned dense multiply, c at its natural (tb, N*H) width.
    fc = sig[:, :NH] * c_ref[...]

    # Minimise live f32 tiles: form i*u immediately, accumulate f_k*c_k,
    # read o only after c_new exists.
    c_new = sig[:, NH:NH + H] * u_g
    for k in range(N):                       # small static unroll
        c_new = c_new + fc[:, k * H:(k + 1) * H]

    h_new = sig[:, NH + H:NH + 2 * H] * jnp.tanh(c_new)

    h_out_ref[...] = h_new.astype(h_out_ref.dtype)   # bf16 on the perf path
    c_out_ref[...] = c_new.astype(c_out_ref.dtype)   # stays f32


# ---------------------------------------------------------------------------
# One-time (per layer) weight packing — hoisted out of the per-node call.
# ---------------------------------------------------------------------------
def pack_tree_lstm_params(params, embedding_dim, hidden_dim, n_ary,
                          matmul_dtype=jnp.bfloat16):
    """Build fused weights Wx (E, OUT), Wh (NH, OUT) and bias (1, OUT).

    Column layout (densely packed, no per-gate lane padding):
        [ f_0 | f_1 | ... | f_{N-1} | i | o | u ],  OUT = (N + 3) * H
    W_f(x) and W_f_b are folded into every child's f block.
    """
    E, H, N = embedding_dim, hidden_dim, n_ary
    NH = N * H
    OUT = (N + 3) * H

    wiou = params["W_iou_w"].T.astype(jnp.float32)   # (E,  3H)  order i,o,u
    uiou = params["U_iou_w"].T.astype(jnp.float32)   # (NH, 3H)
    wf = params["W_f_w"].T.astype(jnp.float32)       # (E,  H)
    uf = params["U_f_w"].T.astype(jnp.float32)       # (NH, NH)

    Wx = jnp.zeros((E, OUT), jnp.float32)
    Wh = jnp.zeros((NH, OUT), jnp.float32)
    b = jnp.zeros((1, OUT), jnp.float32)

    biou = params["W_iou_b"] + params["U_iou_b"]     # valid bias fold

    # Per-child f blocks: W_f / W_f_b folded into each (no separate wfx).
    for k in range(N):
        col = k * H
        Wx = Wx.at[:, col:col + H].set(wf)
        Wh = Wh.at[:, col:col + H].set(uf[:, k * H:(k + 1) * H])
        b = b.at[0, col:col + H].set(params["U_f_b"][k * H:(k + 1) * H]
                                     + params["W_f_b"])

    # i / o / u blocks (torch.chunk order: i, o, u).
    for g in range(3):
        col = NH + g * H
        Wx = Wx.at[:, col:col + H].set(wiou[:, g * H:(g + 1) * H])
        Wh = Wh.at[:, col:col + H].set(uiou[:, g * H:(g + 1) * H])
        b = b.at[0, col:col + H].set(biou[g * H:(g + 1) * H])

    return Wx.astype(matmul_dtype), Wh.astype(matmul_dtype), b  # bias f32


def _choose_tile_b(batch, max_tile_b=512):
    """>=2 grid steps when the batch allows (v7x megacore), tb multiple of 16
    (bf16 sublane packing), capped so tiles stay large but VMEM-friendly."""
    half = -(-batch // 2)                    # ceil(batch / 2)
    tb = _round_up(max(half, 16), 16)
    return min(tb, max_tile_b)


# ---------------------------------------------------------------------------
# Per-(node-batch) call
# ---------------------------------------------------------------------------
def tree_lstm_cell(x, h, c, wx_fused, wh_fused, b_fused, *,
                   hidden_dim, n_ary, tile_b=None, h_dtype=None):
    """Pallas-fused TreeLSTMCell forward. Returns (h_new, c_new)."""
    H, N = hidden_dim, n_ary
    NH = N * H
    B, E = x.shape
    OUT = wx_fused.shape[1]
    assert h.shape == (B, NH) and c.shape == (B, NH)
    assert wx_fused.shape == (E, OUT) and wh_fused.shape == (NH, OUT)
    assert OUT == (N + 3) * H and b_fused.shape == (1, OUT)
    if h_dtype is None:
        h_dtype = wx_fused.dtype             # h feeds the next level's matmul

    tb = _choose_tile_b(B) if tile_b is None else max(16, _round_up(tile_b, 16))
    b_pad = _round_up(B, tb)
    if b_pad != B:                            # only when B isn't tile-aligned
        pad = ((0, b_pad - B), (0, 0))
        x, h, c = jnp.pad(x, pad), jnp.pad(h, pad), jnp.pad(c, pad)
    grid = (b_pad // tb,)

    kernel = functools.partial(_tree_lstm_kernel, hidden_dim=H, n_ary=N)

    h_new, c_new = pl.pallas_call(
        kernel,
        out_shape=(jax.ShapeDtypeStruct((b_pad, H), h_dtype),
                   jax.ShapeDtypeStruct((b_pad, H), jnp.float32)),
        grid_spec=pltpu.PrefetchScalarGridSpec(
            num_scalar_prefetch=0,
            grid=grid,
            in_specs=[
                pl.BlockSpec((tb, E), lambda i: (i, 0)),       # x (unpadded)
                pl.BlockSpec((tb, NH), lambda i: (i, 0)),      # h (unpadded)
                pl.BlockSpec((tb, NH), lambda i: (i, 0)),      # c natural width
                pl.BlockSpec((E, OUT), lambda i: (0, 0)),      # Wx resident
                pl.BlockSpec((NH, OUT), lambda i: (0, 0)),     # Wh resident
                pl.BlockSpec((1, OUT), lambda i: (0, 0)),      # fused bias
            ],
            out_specs=(
                pl.BlockSpec((tb, H), lambda i: (i, 0)),       # h_new
                pl.BlockSpec((tb, H), lambda i: (i, 0)),       # c_new (f32)
            ),
        ),
        compiler_params=pltpu.CompilerParams(
            dimension_semantics=("parallel",)),
    )(x, h, c, wx_fused, wh_fused, b_fused)

    if b_pad != B:
        h_new, c_new = h_new[:B], c_new[:B]
    return h_new, c_new


# ---------------------------------------------------------------------------
# Reference / init / test
# ---------------------------------------------------------------------------
def _init_linear(key, in_f, out_f):
    """Deterministic init matching torch.nn.Linear default (+-1/sqrt(in))."""
    k_w, k_b = jax.random.split(key)
    bound = 1.0 / sqrt(in_f)
    w = jax.random.uniform(k_w, (out_f, in_f), jnp.float32, -bound, bound)
    b = jax.random.uniform(k_b, (out_f,), jnp.float32, -bound, bound)
    return w, b


def _reference(x, h, c, params, hidden_dim, n_ary):
    """Pure-JAX f32 reference of the PyTorch forward."""
    B = x.shape[0]
    iou = (x @ params["W_iou_w"].T + params["W_iou_b"]
           + h @ params["U_iou_w"].T + params["U_iou_b"])
    i, o, u = jnp.split(iou, 3, axis=1)
    i, o, u = jax.nn.sigmoid(i), jax.nn.sigmoid(o), jnp.tanh(u)
    f = (h @ params["U_f_w"].T + params["U_f_b"]).reshape(B, n_ary, hidden_dim)
    f = f + (x @ params["W_f_w"].T + params["W_f_b"])[:, None, :]
    f = jax.nn.sigmoid(f)
    c_new = i * u + jnp.sum(f * c.reshape(B, n_ary, hidden_dim), axis=1)
    h_new = o * jnp.tanh(c_new)
    return h_new, c_new


if __name__ == "__main__":
    # Batch = number of tree nodes processed at one level in one call.
    B, E, H, N_ARY = 256, 32, 32, 4

    key = jax.random.PRNGKey(0)
    ks = jax.random.split(key, 8)

    wiou_w, wiou_b = _init_linear(ks[0], E, 3 * H)
    uiou_w, uiou_b = _init_linear(ks[1], N_ARY * H, 3 * H)
    wf_w, wf_b = _init_linear(ks[2], E, H)
    uf_w, uf_b = _init_linear(ks[3], N_ARY * H, N_ARY * H)

    params = {
        "W_iou_w": wiou_w, "W_iou_b": wiou_b,
        "U_iou_w": uiou_w, "U_iou_b": uiou_b,
        "W_f_w": wf_w, "W_f_b": wf_b,
        "U_f_w": uf_w, "U_f_b": uf_b,
    }

    x = jax.random.normal(ks[4], (B, E), jnp.float32)
    h0 = jax.random.normal(ks[5], (B, N_ARY * H), jnp.float32)
    c0 = jax.random.normal(ks[6], (B, N_ARY * H), jnp.float32)

    h_ref, c_ref = _reference(x, h0, c0, params, H, N_ARY)

    # 1) Exact-math variant (f32 matmul): validates the fused packing exactly.
    wx32, wh32, b32 = pack_tree_lstm_params(params, E, H, N_ARY,
                                            matmul_dtype=jnp.float32)
    h32, c32 = tree_lstm_cell(x, h0, c0, wx32, wh32, b32,
                              hidden_dim=H, n_ary=N_ARY)
    jax.block_until_ready((h32, c32))
    assert jnp.allclose(h32, h_ref, rtol=1e-5, atol=1e-5)
    assert jnp.allclose(c32, c_ref, rtol=1e-5, atol=1e-5)

    # 2) Performance variant (bf16 matmul / bf16 h output, f32 gate math & c).
    wxbf, whbf, bbf = pack_tree_lstm_params(params, E, H, N_ARY,
                                            matmul_dtype=jnp.bfloat16)
    hbf, cbf = tree_lstm_cell(x, h0, c0, wxbf, whbf, bbf,
                              hidden_dim=H, n_ary=N_ARY)
    jax.block_until_ready((hbf, cbf))
    assert hbf.dtype == jnp.bfloat16 and cbf.dtype == jnp.float32
    assert jnp.allclose(hbf.astype(jnp.float32), h_ref, rtol=2e-2, atol=2e-2)
    assert jnp.allclose(cbf, c_ref, rtol=2e-2, atol=2e-2)

    print("KERNEL_OK")
</pallas_src>

<mosaic_0001>
module attributes {stable_mosaic.version = 11 : i64} {
  func.func @_tree_lstm_kernel(%arg0: i32, %arg1: memref<128x32xf32, #tpu.memory_space<vmem>>, %arg2: memref<128x128xf32, #tpu.memory_space<vmem>>, %arg3: memref<128x128xf32, #tpu.memory_space<vmem>>, %arg4: memref<32x224xf32, #tpu.memory_space<vmem>>, %arg5: memref<128x224xf32, #tpu.memory_space<vmem>>, %arg6: memref<1x224xf32, #tpu.memory_space<vmem>>, %arg7: memref<128x32xf32, #tpu.memory_space<vmem>>, %arg8: memref<128x32xf32, #tpu.memory_space<vmem>>) attributes {dimension_semantics = [#tpu.dimension_semantics<parallel>], iteration_bounds = array<i64: 2>, scalar_prefetch = 0 : i64, scratch_operands = 0 : i64, tpu.core_type = #tpu.core_type<tc>, window_params = [{transform_indices = @transform_0, window_bounds = array<i64: 128, 32>}, {transform_indices = @transform_1, window_bounds = array<i64: 128, 128>}, {transform_indices = @transform_2, window_bounds = array<i64: 128, 128>}, {pipeline_mode = #tpu.pipeline_mode<synchronous>, transform_indices = @transform_3, window_bounds = array<i64: 32, 224>}, {pipeline_mode = #tpu.pipeline_mode<synchronous>, transform_indices = @transform_4, window_bounds = array<i64: 128, 224>}, {pipeline_mode = #tpu.pipeline_mode<synchronous>, transform_indices = @transform_5, window_bounds = array<i64: 1, 224>}, {transform_indices = @transform_6, window_bounds = array<i64: 128, 32>}, {transform_indices = @transform_7, window_bounds = array<i64: 128, 32>}]} {
    %c0 = arith.constant 0 : index
    %c0_0 = arith.constant 0 : index
    %0 = vector.load %arg4[%c0, %c0_0] : memref<32x224xf32, #tpu.memory_space<vmem>>, vector<32x224xf32>
    %c0_1 = arith.constant 0 : index
    %c0_2 = arith.constant 0 : index
    %1 = vector.load %arg5[%c0_1, %c0_2] : memref<128x224xf32, #tpu.memory_space<vmem>>, vector<128x224xf32>
    %c0_3 = arith.constant 0 : index
    %c0_4 = arith.constant 0 : index
    %2 = vector.load %arg1[%c0_3, %c0_4] : memref<128x32xf32, #tpu.memory_space<vmem>>, vector<128x32xf32>
    %cst = arith.constant dense<0.000000e+00> : vector<128x224xf32>
    %3 = tpu.matmul %2, %0, %cst {dimension_numbers = #tpu.dot_dimension_numbers<[1], [0], [0], [1], [0, 0, 1, 1], [], []>} : vector<128x32xf32>, vector<32x224xf32>, vector<128x224xf32> -> vector<128x224xf32>
    %c0_5 = arith.constant 0 : index
    %c0_6 = arith.constant 0 : index
    %4 = vector.load %arg2[%c0_5, %c0_6] : memref<128x128xf32, #tpu.memory_space<vmem>>, vector<128x128xf32>
    %cst_7 = arith.constant dense<0.000000e+00> : vector<128x224xf32>
    %5 = tpu.matmul %4, %1, %cst_7 {dimension_numbers = #tpu.dot_dimension_numbers<[1], [0], [0], [1], [0, 0, 1, 1], [], []>} : vector<128x128xf32>, vector<128x224xf32>, vector<128x224xf32> -> vector<128x224xf32>
    %6 = arith.addf %3, %5 : vector<128x224xf32>
    %c0_8 = arith.constant 0 : index
    %c0_9 = arith.constant 0 : index
    %7 = vector.load %arg6[%c0_8, %c0_9] : memref<1x224xf32, #tpu.memory_space<vmem>>, vector<1x224xf32>
    %8 = vector.broadcast %7 : vector<1x224xf32> to vector<128x224xf32>
    %9 = arith.addf %6, %8 : vector<128x224xf32>
    %10 = vector.extract_strided_slice %9 {offsets = [0, 0], sizes = [128, 192], strides = [1, 1]} : vector<128x224xf32> to vector<128x192xf32>
    %11 = arith.negf %10 : vector<128x192xf32>
    %12 = math.exp %11 : vector<128x192xf32>
    %cst_10 = arith.constant 1.000000e+00 : f32
    %13 = vector.broadcast %cst_10 : f32 to vector<128x192xf32>
    %14 = arith.addf %13, %12 : vector<128x192xf32>
    %15 = arith.divf %13, %14 : vector<128x192xf32>
    %16 = vector.extract_strided_slice %9 {offsets = [0, 192], sizes = [128, 32], strides = [1, 1]} : vector<128x224xf32> to vector<128x32xf32>
    %17 = math.tanh %16 : vector<128x32xf32>
    %18 = vector.extract_strided_slice %15 {offsets = [0, 0], sizes = [128, 128], strides = [1, 1]} : vector<128x192xf32> to vector<128x128xf32>
    %c0_11 = arith.constant 0 : index
    %c0_12 = arith.constant 0 : index
    %19 = vector.load %arg3[%c0_11, %c0_12] : memref<128x128xf32, #tpu.memory_space<vmem>>, vector<128x128xf32>
    %20 = arith.mulf %18, %19 : vector<128x128xf32>
    %21 = vector.extract_strided_slice %15 {offsets = [0, 128], sizes = [128, 32], strides = [1, 1]} : vector<128x192xf32> to vector<128x32xf32>
    %22 = arith.mulf %21, %17 : vector<128x32xf32>
    %23 = vector.extract_strided_slice %20 {offsets = [0, 0], sizes = [128, 32], strides = [1, 1]} : vector<128x128xf32> to vector<128x32xf32>
    %24 = arith.addf %22, %23 : vector<128x32xf32>
    %25 = vector.extract_strided_slice %20 {offsets = [0, 32], sizes = [128, 32], strides = [1, 1]} : vector<128x128xf32> to vector<128x32xf32>
    %26 = arith.addf %24, %25 : vector<128x32xf32>
    %27 = vector.extract_strided_slice %20 {offsets = [0, 64], sizes = [128, 32], strides = [1, 1]} : vector<128x128xf32> to vector<128x32xf32>
    %28 = arith.addf %26, %27 : vector<128x32xf32>
    %29 = vector.extract_strided_slice %20 {offsets = [0, 96], sizes = [128, 32], strides = [1, 1]} : vector<128x128xf32> to vector<128x32xf32>
    %30 = arith.addf %28, %29 : vector<128x32xf32>
    %31 = vector.extract_strided_slice %15 {offsets = [0, 160], sizes = [128, 32], strides = [1, 1]} : vector<128x192xf32> to vector<128x32xf32>
    %32 = math.tanh %30 : vector<128x32xf32>
    %33 = arith.mulf %31, %32 : vector<128x32xf32>
    %c0_13 = arith.constant 0 : index
    %c0_14 = arith.constant 0 : index
    %34 = vector.load %arg7[%c0_13, %c0_14] : memref<128x32xf32, #tpu.memory_space<vmem>>, vector<128x32xf32>
    tpu.vector_store %arg7[%c0_13, %c0_14], %33 {strides = array<i32>} : memref<128x32xf32, #tpu.memory_space<vmem>>, vector<128x32xf32>,
    %c0_15 = arith.constant 0 : index
    %c0_16 = arith.constant 0 : index
    %35 = vector.load %arg8[%c0_15, %c0_16] : memref<128x32xf32, #tpu.memory_space<vmem>>, vector<128x32xf32>
    tpu.vector_store %arg8[%c0_15, %c0_16], %30 {strides = array<i32>} : memref<128x32xf32, #tpu.memory_space<vmem>>, vector<128x32xf32>,
    return
  }
  func.func @transform_0(%arg0: i32) -> (i32, i32) {
    %c0_i32 = arith.constant 0 : i32
    %c0_i32_0 = arith.constant 0 : i32
    return %arg0, %c0_i32 : i32, i32
  }
  func.func @transform_1(%arg0: i32) -> (i32, i32) {
    %c0_i32 = arith.constant 0 : i32
    %c0_i32_0 = arith.constant 0 : i32
    return %arg0, %c0_i32 : i32, i32
  }
  func.func @transform_2(%arg0: i32) -> (i32, i32) {
    %c0_i32 = arith.constant 0 : i32
    %c0_i32_0 = arith.constant 0 : i32
    return %arg0, %c0_i32 : i32, i32
  }
  func.func @transform_3(%arg0: i32) -> (i32, i32) {
    %c0_i32 = arith.constant 0 : i32
    %c0_i32_0 = arith.constant 0 : i32
    %c0_i32_1 = arith.constant 0 : i32
    return %c0_i32, %c0_i32_0 : i32, i32
  }
  func.func @transform_4(%arg0: i32) -> (i32, i32) {
    %c0_i32 = arith.constant 0 : i32
    %c0_i32_0 = arith.constant 0 : i32
    %c0_i32_1 = arith.constant 0 : i32
    return %c0_i32, %c0_i32_0 : i32, i32
  }
  func.func @transform_5(%arg0: i32) -> (i32, i32) {
    %c0_i32 = arith.constant 0 : i32
    %c0_i32_0 = arith.constant 0 : i32
    %c0_i32_1 = arith.constant 0 : i32
    return %c0_i32, %c0_i32_0 : i32, i32
  }
  func.func @transform_6(%arg0: i32) -> (i32, i32) {
    %c0_i32 = arith.constant 0 : i32
    %c0_i32_0 = arith.constant 0 : i32
    return %arg0, %c0_i32 : i32, i32
  }
  func.func @transform_7(%arg0: i32) -> (i32, i32) {
    %c0_i32 = arith.constant 0 : i32
    %c0_i32_0 = arith.constant 0 : i32
    return %arg0, %c0_i32 : i32, i32
  }
}

</mosaic_0001>

<bundles_post_ra>
// kernel: tpu_custom_call.1
= control target key start
LH: loop header
LB: loop body
LE: loop exit
PB: predicated region body
PF: predicated region fallthrough
CT: control target
= control target key end

     0   :  { %s2070_s24 = smov 0   ;;  %s2833_s0 = inlined_call_operand.vmem [shape: f32[256,32], index: 0, kind: input, shape index: {}]   ;;  %s2834_s1 = inlined_call_operand.vmem [shape: f32[256,128], index: 1, kind: input, shape index: {}]   ;;  %s2835_s2 = inlined_call_operand.vmem [shape: f32[256,128], index: 2, kind: input, shape index: {}]   ;;  %s2836_s3 = inlined_call_operand.vmem [shape: f32[32,224], index: 3, kind: input, shape index: {}]   ;;  %s2837_s4 = inlined_call_operand.vmem [shape: f32[128,224], index: 4, kind: input, shape index: {}]   ;;  %s2838_s5 = inlined_call_operand.vmem [shape: f32[1,224], index: 5, kind: input, shape index: {}]   ;;  %s2839_s6 = inlined_call_operand.vmem [shape: f32[256,32], index: 6, kind: output, shape index: {0}]   ;;  %s2840_s7 = inlined_call_operand.vmem [shape: f32[256,32], index: 7, kind: output, shape index: {1}]  }
   0x1 LB: > { %s1677_s25 = sadd.s32 4294967295, %s2024_s24   ;;  %p1681_p0 = scmp.ge.s32.totalorder %s2024_s24, 1  ;;  %s2024_s24 = sphi %s2070_s24, %s18_s24  }
   0x2   : > { %p263_p1 = scmp.lt.s32.totalorder %s2024_s24, 3 }
   0x4   : > { %p264_p2 = pnand %p1681_p0, %p263_p1 }
   0x5   : > { %v349_v0 = vld [vmem:[%s2837_s4 + $0x8] sm:$0xff] (!%p264_p2)  ;;  %v351_v1 = vld [vmem:[%s2837_s4 + $0x18] sm:$0xff] (!%p264_p2)  ;;  %v348_v2 = vld [vmem:[%s2837_s4] sm:$0xff] (!%p264_p2)  ;;  %s1682_s9 = sshll.u32 (!%p264_p2), %s1677_s25, 4  ;;  %v2026_v7 = vmov (!%p264_p2), 0.0   ;;  %vm573_vm0 = vcmask (!%p264_p2), 261120  }
   0x6   : > { %267 = sbr.rel (%p264_p2) target bundleno = 768 (0x300), region = 44  ;;  %v1742_v3 = vpack.c.bf16 (!%p264_p2), %v351_v1, %v349_v0  ;;  %v350_v4 = vld [vmem:[%s2837_s4 + $0x10] sm:$0xff] (!%p264_p2)  ;;  %v353_v5 = vld [vmem:[%s2837_s4 + $0x28] sm:$0xff] (!%p264_p2)  ;;  %v355_v6 = vld [vmem:[%s2837_s4 + $0x38] sm:$0xff] (!%p264_p2)  ;;  %686 = vmatprep.mubr.f32.mxu0 (!%p264_p2), %v2026_v7  ;;  %476 = vmatprep.mubr.f32.mxu1 (!%p264_p2), %v2026_v7  ;;  %p311_p3 = scmp.lt.s32.totalorder (!%p264_p2), %s1682_s9, 31 }
   0x7   : > { %v1744_v8 = vpack.c.bf16 (!%p264_p2), %v350_v4, %v348_v2  ;;  %v1746_v9 = vpack.c.bf16 (!%p264_p2), %v355_v6, %v353_v5  ;;  %v352_v10 = vld [vmem:[%s2837_s4 + $0x20] sm:$0xff] (!%p264_p2)  ;;  %v354_v11 = vld [vmem:[%s2837_s4 + $0x30] sm:$0xff] (!%p264_p2)  ;;  %v357_v12 = vld [vmem:[%s2837_s4 + $0x48] sm:$0xff] (!%p264_p2)  ;;  %s2027_s8 = smov (!%p264_p2), 64   ;;  %s2028_s13 = smov (!%p264_p2), 96  }
   0x8   : > { %1743 = vmatprep.subr.bf16.mxu1 (!%p264_p2), %v1742_v3  ;;  %v359_v13 = vld [vmem:[%s2837_s4 + $0x58] sm:$0xff] (!%p264_p2)  ;;  %v1748_v14 = vpack.c.bf16 (!%p264_p2), %v354_v11, %v352_v10  ;;  %v356_v16 = vld [vmem:[%s2837_s4 + $0x40] sm:$0xff] (!%p264_p2)  ;;  %v358_v17 = vld [vmem:[%s2837_s4 + $0x50] sm:$0xff] (!%p264_p2)  ;;  %s2029_s14 = smov (!%p264_p2), 32  }
   0x9   : > { %1745 = vmatpush1.bf16.msra.mxu1 (!%p264_p2), %v1744_v8  ;;  %v1750_v15 = vpack.c.bf16 (!%p264_p2), %v359_v13, %v357_v12  ;;  %v361_v18 = vld [vmem:[%s2837_s4 + $0x68] sm:$0xff] (!%p264_p2)  ;;  %v363_v19 = vld [vmem:[%s2837_s4 + $0x78] sm:$0xff] (!%p264_p2)  ;;  %v1752_v20 = vpack.c.bf16 (!%p264_p2), %v358_v17, %v356_v16  ;;  %v360_v21 = vld [vmem:[%s2837_s4 + $0x60] sm:$0xff] (!%p264_p2) }
   0xa   : > { %1747 = vmatprep.subr.bf16.mxu1 (!%p264_p2), %v1746_v9  ;;  %v341_v22 = vld [vmem:[%s2836_s3 + $0x8] sm:$0xff] (!%p264_p2)  ;;  %v343_v23 = vld [vmem:[%s2836_s3 + $0x18] sm:$0xff] (!%p264_p2)  ;;  %v1754_v24 = vpack.c.bf16 (!%p264_p2), %v363_v19, %v361_v18  ;;  %v362_v25 = vld [vmem:[%s2837_s4 + $0x70] sm:$0xff] (!%p264_p2) }
   0xb   : > { %v1774_v26 = vpack.c.bf16 (!%p264_p2), %v343_v23, %v341_v22  ;;  %v340_v27 = vld [vmem:[%s2836_s3] sm:$0xff] (!%p264_p2)  ;;  %v342_v28 = vld [vmem:[%s2836_s3 + $0x10] sm:$0xff] (!%p264_p2)  ;;  %v365_v29 = vld [vmem:[%s2837_s4 + $0x88] sm:$0xff] (!%p264_p2)  ;;  %v1756_v34 = vpack.c.bf16 (!%p264_p2), %v362_v25, %v360_v21 }
   0xc   : > { %v367_v30 = vld [vmem:[%s2837_s4 + $0x98] sm:$0xff] (!%p264_p2)  ;;  %v1776_v31 = vpack.c.bf16 (!%p264_p2), %v342_v28, %v340_v27  ;;  %v345_v32 = vld [vmem:[%s2836_s3 + $0x28] sm:$0xff] (!%p264_p2)  ;;  %v344_v36 = vld [vmem:[%s2836_s3 + $0x20] sm:$0xff] (!%p264_p2) }
   0xd   : > { %s2842_s9 = smov (!%p311_p3, %s1682_s9), 31  ;;  %1749 = vmatpush1.bf16.msra.mxu1 %v1748_v14  ;;  %1775 = vmatprep.subr.bf16.mxu0 %v1774_v26  ;;  %v347_v33 = vld [vmem:[%s2836_s3 + $0x38] sm:$0xff]  ;;  %v346_v37 = vld [vmem:[%s2836_s3 + $0x30] sm:$0xff]  ;;  %v1758_v38 = vpack.c.bf16 %v367_v30, %v365_v29  ;;  %v364_v39 = vld [vmem:[%s2837_s4 + $0x80] sm:$0xff] }
   0xe   : > { %1751 = vmatprep.subr.bf16.mxu1 %v1750_v15  ;;  %s2149_s30 = sshll.u32 %s2842_s9, 3  ;;  %1777 = vmatpush1.bf16.msra.mxu0 %v1776_v31  ;;  %v1778_v35 = vpack.c.bf16 %v347_v33, %v345_v32  ;;  %v366_v40 = vld [vmem:[%s2837_s4 + $0x90] sm:$0xff]  ;;  %v1780_v41 = vpack.c.bf16 %v346_v37, %v344_v36  ;;  %v369_v42 = vld [vmem:[%s2837_s4 + $0xa8] sm:$0xff]  ;;  %v371_v43 = vld [vmem:[%s2837_s4 + $0xb8] sm:$0xff]  ;;  %v785_v32 = vlaneseq }
   0xf   : > { %s2170_s20 = scalar_lea.vmem %s2833_s0, %s2149_s30  ;;  %v1760_v44 = vpack.c.bf16 %v366_v40, %v364_v39  ;;  %v1762_v46 = vpack.c.bf16 %v371_v43, %v369_v42  ;;  %v368_v47 = vld [vmem:[%s2837_s4 + $0xa0] sm:$0xff]  ;;  %v370_v48 = vld [vmem:[%s2837_s4 + $0xb0] sm:$0xff]  ;;  %v373_v49 = vld [vmem:[%s2837_s4 + $0xc8] sm:$0xff]  ;;  %s2222_s28 = scalar_lea.vmem %s2834_s1, %s2149_s30 }
  0x10   : > { %1779 = vmatprep.subr.bf16.mxu0 %v1778_v35  ;;  %v380_v45 = vld [vmem:[%s2170_s20] sm:$0xff]  ;;  %v375_v50 = vld [vmem:[%s2837_s4 + $0xd8] sm:$0xff]  ;;  %v1764_v51 = vpack.c.bf16 %v370_v48, %v368_v47  ;;  %v381_v52 = vld [vmem:[%s2170_s20 + $0x8] sm:$0xff]  ;;  %v786_v35 = vshrl.u32 %v785_v32, 7  ;;  %s2342_s12 = scalar_lea.vmem %s2835_s2, %s2149_s30  ;;  %s2617_s16 = scalar_lea.vmem %s2840_s7, %s2149_s30 }
  0x11   : > { %1753 = vmatpush1.bf16.msra.mxu1 %v1752_v20  ;;  %v1766_v53 = vpack.c.bf16 %v375_v50, %v373_v49  ;;  %v372_v54 = vld [vmem:[%s2837_s4 + $0xc0] sm:$0xff]  ;;  %v374_v55 = vld [vmem:[%s2837_s4 + $0xd0] sm:$0xff]  ;;  %v377_v56 = vld [vmem:[%s2837_s4 + $0xe8] sm:$0xff]  ;;  %s2796_s19 = scalar_lea.vmem %s2839_s6, %s2149_s30 }
  0x12   : > { %1755 = vmatprep.subr.bf16.mxu1 %v1754_v24  ;;  %1781 = vmatpush1.bf16.msra.mxu0 %v1780_v41  ;;  %v379_v57 = vld [vmem:[%s2837_s4 + $0xf8] sm:$0xff]  ;;  %v1768_v58 = vpack.c.bf16 %v374_v55, %v372_v54  ;;  %v382_v59 = vld [vmem:[%s2170_s20 + $0x10] sm:$0xff]  ;;  %v376_v61 = vld [vmem:[%s2837_s4 + $0xe0] sm:$0xff]  ;;  %v791_v40 = vsub.s32 1, %v786_v35 }
  0x13   : > { %v1770_v60 = vpack.c.bf16 %v379_v57, %v377_v56  ;;  %v378_v62 = vld [vmem:[%s2837_s4 + $0xf0] sm:$0xff]  ;;  %v383_v0 = vld [vmem:[%s2170_s20 + $0x18] sm:$0xff]  ;;  %v396_v1 = vld [vmem:[%s2222_s28] sm:$0xff] }
  0x14   : > { %v1772_v63 = vpack.c.bf16 %v378_v62, %v376_v61  ;;  %v384_v2 = vld [vmem:[%s2170_s20 + $0x20] sm:$0xff]  ;;  %v397_v3 = vld [vmem:[%s2222_s28 + $0x8] sm:$0xff]  ;;  %v398_v5 = vld [vmem:[%s2222_s28 + $0x10] sm:$0xff] }
  0x15   : > { %1757 = vmatpush1.bf16.msra.mxu1 %v1756_v34  ;;  %1692 = vmatmul.mubr.msk.f32.vlgmr.msra.gmra.mrb[0].mxu0 %vm573_vm0, %v380_v45  ;;  %v385_v4 = vld [vmem:[%s2170_s20 + $0x28] sm:$0xff]  ;;  %v386_v6 = vld [vmem:[%s2170_s20 + $0x30] sm:$0xff]  ;;  %v399_v8 = vld [vmem:[%s2222_s28 + $0x18] sm:$0xff] }
  0x16   : > { %1759 = vmatprep.subr.bf16.mxu1 %v1758_v38  ;;  %692 = vmatprep.mubr.f32.mxu0 %v2026_v7  ;;  %v387_v9 = vld [vmem:[%s2170_s20 + $0x38] sm:$0xff]  ;;  %v400_v10 = vld [vmem:[%s2222_s28 + $0x20] sm:$0xff]  ;;  %v401_v12 = vld [vmem:[%s2222_s28 + $0x28] sm:$0xff]  ;;  %v787_v38 = vsub.s32 0, %v786_v35 }
  0x17   : > { %v388_v11 = vld [vmem:[%s2170_s20 + $0x40] sm:$0xff]  ;;  %v389_v13 = vld [vmem:[%s2170_s20 + $0x48] sm:$0xff]  ;;  %v402_v14 = vld [vmem:[%s2222_s28 + $0x30] sm:$0xff] }
  0x18   : > { %v390_v15 = vld [vmem:[%s2170_s20 + $0x50] sm:$0xff]  ;;  %v403_v16 = vld [vmem:[%s2222_s28 + $0x38] sm:$0xff]  ;;  %v404_v18 = vld [vmem:[%s2222_s28 + $0x40] sm:$0xff] }
  0x19   : > { %1761 = vmatpush1.bf16.msra.mxu1 %v1760_v44  ;;  %1693 = vmatmul.mubr.msk.f32.gmra.mrb[2].mxu0 %vm573_vm0, %v381_v52  ;;  %v391_v17 = vld [vmem:[%s2170_s20 + $0x58] sm:$0xff]  ;;  %v392_v19 = vld [vmem:[%s2170_s20 + $0x60] sm:$0xff]  ;;  %v405_v20 = vld [vmem:[%s2222_s28 + $0x48] sm:$0xff] }
  0x1a   : > { %1763 = vmatprep.subr.bf16.mxu1 %v1762_v46  ;;  %698 = vmatprep.mubr.f32.mxu0 %v2026_v7  ;;  %v393_v21 = vld [vmem:[%s2170_s20 + $0x68] sm:$0xff]  ;;  %v406_v22 = vld [vmem:[%s2222_s28 + $0x50] sm:$0xff]  ;;  %v407_v24 = vld [vmem:[%s2222_s28 + $0x58] sm:$0xff] }
  0x1b   : > { %v394_v23 = vld [vmem:[%s2170_s20 + $0x70] sm:$0xff]  ;;  %v395_v25 = vld [vmem:[%s2170_s20 + $0x78] sm:$0xff]  ;;  %v408_v26 = vld [vmem:[%s2222_s28 + $0x60] sm:$0xff] }
  0x1c   : > { %v409_v27 = vld [vmem:[%s2222_s28 + $0x68] sm:$0xff]  ;;  %v410_v28 = vld [vmem:[%s2222_s28 + $0x70] sm:$0xff]  ;;  %v411_v29 = vld [vmem:[%s2222_s28 + $0x78] sm:$0xff] }
  0x1d   : > { %1765 = vmatpush1.bf16.msra.mxu1 %v1764_v51  ;;  %1694 = vmatmul.mubr.msk.f32.gmra.mrb[4].mxu0 %vm573_vm0, %v382_v59  ;;  %v783_v39 = vld [vmem:[%s2838_s5] sm:$0x3] }
  0x1e   : > { %1767 = vmatprep.subr.bf16.mxu1 %v1766_v53  ;;  %704 = vmatprep.mubr.f32.mxu0 %v2026_v7  ;;  %v2295_v43 = vrot.slane %v783_v39, %v787_v38  ;;  %v2297_v44 = vrot.slane %v783_v39, %v791_v40 }
  0x21   : > { %1769 = vmatpush1.bf16.msra.mxu1 %v1768_v58  ;;  %1695 = vmatmul.mubr.msk.f32.gmra.mrb[6].mxu0 %vm573_vm0, %v383_v0 }
  0x22   : > { %1771 = vmatprep.subr.bf16.mxu1 %v1770_v60  ;;  %710 = vmatprep.mubr.f32.mxu0 %v2026_v7 }
  0x25   : > { %1773 = vmatpush1.bf16.msra.mxu1 %v1772_v63  ;;  %1696 = vmatmul.mubr.msk.f32.gmra.mrb[8].mxu0 %vm573_vm0, %v384_v2 }
  0x26   : > { %716 = vmatprep.mubr.f32.mxu0 %v2026_v7 }
  0x28   : > { %477 = vmatmul.mubr.f32.vlgmr.msra.gmra.mrb[0].mxu1 %v396_v1 }
  0x29   : > { %482 = vmatprep.mubr.f32.mxu1 %v2026_v7  ;;  %1697 = vmatmul.mubr.msk.f32.gmra.mrb[10].mxu0 %vm573_vm0, %v385_v4 }
  0x2a   : > { %722 = vmatprep.mubr.f32.mxu0 %v2026_v7 }
  0x2c   : > { %483 = vmatmul.mubr.f32.gmra.mrb[2].mxu1 %v397_v3 }
  0x2d   : > { %488 = vmatprep.mubr.f32.mxu1 %v2026_v7  ;;  %1698 = vmatmul.mubr.msk.f32.gmra.mrb[12].mxu0 %vm573_vm0, %v386_v6 }
  0x2e   : > { %728 = vmatprep.mubr.f32.mxu0 %v2026_v7 }
  0x30   : > { %489 = vmatmul.mubr.f32.gmra.mrb[4].mxu1 %v398_v5 }
  0x31   : > { %494 = vmatprep.mubr.f32.mxu1 %v2026_v7  ;;  %1699 = vmatmul.mubr.msk.f32.gmra.mrb[14].mxu0 %vm573_vm0, %v387_v9 }
  0x32   : > { %734 = vmatprep.mubr.f32.mxu0 %v2026_v7 }
  0x34   : > { %495 = vmatmul.mubr.f32.gmra.mrb[6].mxu1 %v399_v8 }
  0x35   : > { %500 = vmatprep.mubr.f32.mxu1 %v2026_v7  ;;  %1700 = vmatmul.mubr.msk.f32.gmra.mrb[16].mxu0 %vm573_vm0, %v388_v11 }
  0x36   : > { %740 = vmatprep.mubr.f32.mxu0 %v2026_v7 }
  0x38   : > { %501 = vmatmul.mubr.f32.gmra.mrb[8].mxu1 %v400_v10 }
  0x39   : > { %506 = vmatprep.mubr.f32.mxu1 %v2026_v7  ;;  %1701 = vmatmul.mubr.msk.f32.gmra.mrb[18].mxu0 %vm573_vm0, %v389_v13 }
  0x3a   : > { %746 = vmatprep.mubr.f32.mxu0 %v2026_v7 }
  0x3c   : > { %507 = vmatmul.mubr.f32.gmra.mrb[10].mxu1 %v401_v12 }
  0x3d   : > { %512 = vmatprep.mubr.f32.mxu1 %v2026_v7  ;;  %1702 = vmatmul.mubr.msk.f32.gmra.mrb[20].mxu0 %vm573_vm0, %v390_v15 }
  0x3e   : > { %752 = vmatprep.mubr.f32.mxu0 %v2026_v7 }
  0x40   : > { %513 = vmatmul.mubr.f32.gmra.mrb[12].mxu1 %v402_v14 }
  0x41   : > { %518 = vmatprep.mubr.f32.mxu1 %v2026_v7  ;;  %1703 = vmatmul.mubr.msk.f32.gmra.mrb[22].mxu0 %vm573_vm0, %v391_v17 }
  0x42   : > { %758 = vmatprep.mubr.f32.mxu0 %v2026_v7 }
  0x44   : > { %519 = vmatmul.mubr.f32.gmra.mrb[14].mxu1 %v403_v16 }
  0x45   : > { %524 = vmatprep.mubr.f32.mxu1 %v2026_v7  ;;  %1704 = vmatmul.mubr.msk.f32.gmra.mrb[24].mxu0 %vm573_vm0, %v392_v19 }
  0x46   : > { %764 = vmatprep.mubr.f32.mxu0 %v2026_v7 }
  0x48   : > { %525 = vmatmul.mubr.f32.gmra.mrb[16].mxu1 %v404_v18 }
  0x49   : > { %530 = vmatprep.mubr.f32.mxu1 %v2026_v7  ;;  %1705 = vmatmul.mubr.msk.f32.gmra.mrb[26].mxu0 %vm573_vm0, %v393_v21 }
  0x4a   : > { %770 = vmatprep.mubr.f32.mxu0 %v2026_v7 }
  0x4c   : > { %531 = vmatmul.mubr.f32.gmra.mrb[18].mxu1 %v405_v20 }
  0x4d   : > { %536 = vmatprep.mubr.f32.mxu1 %v2026_v7  ;;  %1706 = vmatmul.mubr.msk.f32.gmra.mrb[28].mxu0 %vm573_vm0, %v394_v23 }
  0x4e   : > { %776 = vmatprep.mubr.f32.mxu0 %v2026_v7 }
  0x50   : > { %537 = vmatmul.mubr.f32.gmra.mrb[20].mxu1 %v406_v22 }
  0x51   : > { %542 = vmatprep.mubr.f32.mxu1 %v2026_v7  ;;  %1707 = vmatmul.mubr.msk.f32.gmra.mrb[30].mxu0 %vm573_vm0, %v395_v25 }
  0x54   : > { %543 = vmatmul.mubr.f32.gmra.mrb[22].mxu1 %v407_v24 }
  0x55   : > { %548 = vmatprep.mubr.f32.mxu1 %v2026_v7 }
  0x58   : > { %549 = vmatmul.mubr.f32.gmra.mrb[24].mxu1 %v408_v26 }
  0x59   : > { %554 = vmatprep.mubr.f32.mxu1 %v2026_v7 }
  0x5c   : > { %555 = vmatmul.mubr.f32.gmra.mrb[26].mxu1 %v409_v27 }
  0x5d   : > { %560 = vmatprep.mubr.f32.mxu1 %v2026_v7 }
  0x60   : > { %561 = vmatmul.mubr.f32.gmra.mrb[28].mxu1 %v410_v28 }
  0x61   : > { %566 = vmatprep.mubr.f32.mxu1 %v2026_v7 }
  0x64   : > { %567 = vmatmul.mubr.f32.gmra.mrb[30].mxu1 %v411_v29 }
  0xe8   : > { %v688_v30 = vpop.f32.mrb[0].mxu0 }
  0xe9   : > { %v690_v31 = vpop.f32.mrb[1].mxu0 }
  0xec   : > { %v694_v33 = vpop.f32.mrb[2].mxu0 }
  0xed   : > { %v696_v34 = vpop.f32.mrb[3].mxu0 }
  0xf0   : > { %v700_v36 = vpop.f32.mrb[4].mxu0 }
  0xf1   : > { %v702_v37 = vpop.f32.mrb[5].mxu0 }
  0xf4   : > { %v706_v41 = vpop.f32.mrb[6].mxu0 }
  0xf5   : > { %v708_v42 = vpop.f32.mrb[7].mxu0 }
  0xf8   : > { %v712_v45 = vpop.f32.mrb[8].mxu0 }
  0xf9   : > { %v714_v48 = vpop.f32.mrb[9].mxu0 }
  0xfb   : > { %v478_v7 = vpop.f32.mrb[0].mxu1 }
  0xfc   : > { %v689_v46 = vadd.f32 %v688_v30, %v478_v7  ;;  %v480_v47 = vpop.f32.mrb[1].mxu1  ;;  %v718_v53 = vpop.f32.mrb[10].mxu0 }
  0xfd   : > { %v691_v49 = vadd.f32 %v690_v31, %v480_v47  ;;  %v720_v57 = vpop.f32.mrb[11].mxu0 }
  0xfe   : > { %v795_v50 = vadd.f32 %v2295_v43, %v689_v46 }
  0xff   : > { %v2301_v51 = vadd.f32 %v2297_v44, %v691_v49  ;;  %v484_v52 = vpop.f32.mrb[2].mxu1 }
 0x100   : > { %v1708_v54 = vmul.f32 -1.442695, %v795_v50  ;;  %v695_v55 = vadd.f32 %v694_v33, %v484_v52  ;;  %v486_v56 = vpop.f32.mrb[3].mxu1  ;;  %v724_v62 = vpop.f32.mrb[12].mxu0 }
 0x101   : > { %1826 = vtanh.f32 %v2301_v51  ;;  %v697_v58 = vadd.f32 %v696_v34, %v486_v56  ;;  %v726_v1 = vpop.f32.mrb[13].mxu0 }
 0x102   : > { %v797_v59 = vadd.f32 %v2295_v43, %v695_v55  ;;  %1828 = vpow2.f32 %v1708_v54 }
 0x103   : > { %v2306_v60 = vadd.f32 %v2297_v44, %v697_v58  ;;  %v490_v61 = vpop.f32.mrb[4].mxu1 }
 0x104   : > { %v701_v63 = vadd.f32 %v700_v36, %v490_v61  ;;  %v492_v0 = vpop.f32.mrb[5].mxu1  ;;  %v1710_v3 = vmul.f32 -1.442695, %v797_v59  ;;  %v730_v6 = vpop.f32.mrb[14].mxu0 }
 0x105   : > { %1830 = vtanh.f32 %v2306_v60  ;;  %v703_v2 = vadd.f32 %v702_v37, %v492_v0  ;;  %v732_v10 = vpop.f32.mrb[15].mxu0 }
 0x106   : > { %v799_v16 = vadd.f32 %v2295_v43, %v701_v63 }
 0x107   : > { %v2310_v4 = vadd.f32 %v2297_v44, %v703_v2  ;;  %v496_v5 = vpop.f32.mrb[6].mxu1 }
 0x108   : > { %v707_v8 = vadd.f32 %v706_v41, %v496_v5  ;;  %v498_v9 = vpop.f32.mrb[7].mxu1  ;;  %v736_v15 = vpop.f32.mrb[16].mxu0  ;;  %v1712_v25 = vmul.f32 -1.442695, %v799_v16  ;;  %v1035_v5 = vld [vmem:[%s2342_s12] sm:$0xff] }
 0x109   : > { %1832 = vtanh.f32 %v2310_v4  ;;  %v709_v11 = vadd.f32 %v708_v42, %v498_v9  ;;  %v738_v19 = vpop.f32.mrb[17].mxu0 }
 0x10a   : > { %1834 = vpow2.f32 %v1710_v3  ;;  %v801_v31 = vadd.f32 %v2295_v43, %v707_v8 }
 0x10b   : > { %v1827_v12 = vpop.eup %1826  ;;  %v2314_v13 = vadd.f32 %v2297_v44, %v709_v11  ;;  %v502_v14 = vpop.f32.mrb[8].mxu1 }
 0x10c   : > { %v713_v17 = vadd.f32 %v712_v45, %v502_v14  ;;  %v504_v18 = vpop.f32.mrb[9].mxu1  ;;  %1083 = vrot.lane.b32.xlu0 %v1827_v12, %s2027_s8  ;;  %v1829_v21 = vpop.eup %1828  ;;  %v1714_v41 = vmul.f32 -1.442695, %v801_v31 }
 0x10d   : > { %1836 = vtanh.f32 %v2314_v13  ;;  %v715_v20 = vadd.f32 %v714_v48, %v504_v18  ;;  %v742_v24 = vpop.f32.mrb[18].mxu0  ;;  %v923_v29 = vadd.f32 1.0, %v1829_v21 }
 0x10e   : > { %v744_v28 = vpop.f32.mrb[19].mxu0  ;;  %1838 = vpow2.f32 %v1712_v25  ;;  %v803_v58 = vadd.f32 %v2295_v43, %v713_v17 }
 0x10f   : > { %v1831_v22 = vpop.eup %1830  ;;  %v508_v23 = vpop.f32.mrb[10].mxu1  ;;  %v2322_v32 = vadd.f32 %v2297_v44, %v715_v20  ;;  %1840 = vrcp.f32 %v923_v29 }
 0x110   : > { %v719_v26 = vadd.f32 %v718_v53, %v508_v23  ;;  %v510_v27 = vpop.f32.mrb[11].mxu1  ;;  %1085 = vrot.lane.b32.xlu0 %v1831_v22, %s2027_s8  ;;  %v748_v35 = vpop.f32.mrb[20].mxu0 }
 0x111   : > { %v721_v30 = vadd.f32 %v720_v57, %v510_v27  ;;  %v750_v39 = vpop.f32.mrb[21].mxu0  ;;  %1842 = vtanh.f32 %v2322_v32  ;;  %v1036_v27 = vld [vmem:[%s2342_s12 + $0x8] sm:$0xff] }
 0x112   : > { %1844 = vpow2.f32 %v1714_v41 }
 0x113   : > { %v1833_v33 = vpop.eup %1832  ;;  %v514_v34 = vpop.f32.mrb[12].mxu1  ;;  %v2329_v47 = vadd.f32 %v2297_v44, %v721_v30 }
 0x114   : > { %v1835_v36 = vpop.eup %1834  ;;  %1087 = vrot.lane.b32.xlu1 %v1833_v33, %s2027_s8  ;;  %v2325_v37 = vadd.f32 %v724_v62, %v514_v34  ;;  %v516_v38 = vpop.f32.mrb[13].mxu1 }
 0x115   : > { %v727_v40 = vadd.f32 %v726_v1, %v516_v38  ;;  %v925_v7 = vadd.f32 1.0, %v1835_v36  ;;  %v754_v46 = vpop.f32.mrb[22].mxu0 }
 0x116   : > { %v756_v50 = vpop.f32.mrb[23].mxu0 }
 0x117   : > { %v1837_v42 = vpop.eup %1836  ;;  %v520_v45 = vpop.f32.mrb[14].mxu1  ;;  %1846 = vrcp.f32 %v925_v7  ;;  %v2352_v3 = vadd.f32 %v2297_v44, %v727_v40 }
 0x118   : > { %1089 = vrot.lane.b32.xlu1 %v1837_v42, %s2027_s8  ;;  %v2332_v48 = vadd.f32 %v730_v6, %v520_v45  ;;  %v522_v49 = vpop.f32.mrb[15].mxu1  ;;  %v760_v54 = vpop.f32.mrb[24].mxu0  ;;  %1848 = vtanh.f32 %v2329_v47 }
 0x119   : > { %v733_v52 = vadd.f32 %v732_v10, %v522_v49  ;;  %v2335_v57 = vpop.f32.mrb[25].mxu0  ;;  %v1839_v61 = vpop.eup %1838  ;;  %v1716_v10 = vmul.f32 -1.442695, %v803_v58  ;;  %1850 = vtanh.f32 %v2352_v3  ;;  %v807_v49 = vadd.f32 %v2295_v43, %v2325_v37 }
 0x11a   : > { %v1841_v63 = vpop.eup %1840  ;;  %v927_v12 = vadd.f32 1.0, %v1839_v61  ;;  %v1037_v61 = vld [vmem:[%s2342_s12 + $0x10] sm:$0xff] }
 0x11b   : > { %v526_v53 = vpop.f32.mrb[16].mxu1  ;;  %v1843_v2 = vpop.eup %1842  ;;  %v2364_v16 = vmul.f32 %v1841_v63, %v1035_v5  ;;  %1852 = vpow2.f32 %v1716_v10 }
 0x11c   : > { %v737_v55 = vadd.f32 %v736_v15, %v526_v53  ;;  %v528_v56 = vpop.f32.mrb[17].mxu1  ;;  %v2349_v1 = vpop.f32.mrb[26].mxu0  ;;  %1091 = vrot.lane.b32.xlu0 %v1843_v2, %s2027_s8  ;;  %v805_v15 = vadd.f32 %v2295_v43, %v719_v26  ;;  %1854 = vrcp.f32 %v927_v12  ;;  %v2374_v26 = vadd.f32 %v2297_v44, %v733_v52 }
 0x11d   : > { %v2344_v59 = vadd.f32 %v738_v19, %v528_v56  ;;  %v2355_v9 = vpop.f32.mrb[27].mxu0  ;;  %v1845_v19 = vpop.eup %1844 }
 0x11e   : > { %v2347_v62 = vadd.f32 %v2295_v43, %v737_v55  ;;  %v1718_v29 = vmul.f32 -1.442695, %v805_v15  ;;  %v929_v34 = vadd.f32 1.0, %v1845_v19  ;;  %1856 = vtanh.f32 %v2374_v26 }
 0x11f   : > { %v532_v0 = vpop.f32.mrb[18].mxu1  ;;  %v2412_v37 = vadd.f32 %v2297_v44, %v2344_v59 }
 0x120   : > { %v743_v6 = vadd.f32 %v742_v24, %v532_v0  ;;  %v534_v8 = vpop.f32.mrb[19].mxu1  ;;  %v2366_v18 = vpop.f32.mrb[28].mxu0  ;;  %1179 = vrot.lane.b32.xlu0 %v2364_v16, %s2028_s13  ;;  %1858 = vpow2.f32 %v1718_v29  ;;  %v1720_v0 = vmul.f32 -1.442695, %v807_v49 }
 0x121   : > { %v2358_v11 = vadd.f32 %v744_v28, %v534_v8  ;;  %v2369_v22 = vpop.f32.mrb[29].mxu0  ;;  %v1847_v23 = vpop.eup %1846  ;;  %1860 = vrcp.f32 %v929_v34  ;;  %v809_v8 = vadd.f32 %v2295_v43, %v2332_v48 }
 0x122   : > { %v2361_v14 = vadd.f32 %v2295_v43, %v743_v6  ;;  %v1849_v25 = vpop.eup %1848  ;;  %1862 = vtanh.f32 %v2412_v37 }
 0x123   : > { %v538_v17 = vpop.f32.mrb[20].mxu1  ;;  %1093 = vrot.lane.b32.xlu1 %v1849_v25, %s2027_s8  ;;  %v1851_v52 = vpop.eup %1850  ;;  %1864 = vpow2.f32 %v1720_v0 }
 0x124   : > { %v749_v20 = vadd.f32 %v748_v35, %v538_v17  ;;  %v540_v21 = vpop.f32.mrb[21].mxu1  ;;  %v778_v33 = vpop.f32.mrb[30].mxu0  ;;  %1243 = vrot.lane.b32.xlu0 %v2364_v16, %s2027_s8 }
 0x125   : > { %v751_v24 = vadd.f32 %v750_v39, %v540_v21  ;;  %v780_v38 = vpop.f32.mrb[31].mxu0  ;;  %v2384_v39 = vmul.f32 %v1847_v23, %v1036_v27  ;;  %v1853_v55 = vpop.eup %1852  ;;  %v1038_v21 = vld [vmem:[%s2342_s12 + $0x18] sm:$0xff] }
 0x126   : > { %v2378_v28 = vadd.f32 %v2295_v43, %v749_v20  ;;  %v1855_v58 = vpop.eup %1854  ;;  %v931_v5 = vadd.f32 1.0, %v1853_v55  ;;  %v2437_v20 = vadd.f32 %v2297_v44, %v2358_v11 }
 0x127   : > { %v2382_v30 = vadd.f32 %v2297_v44, %v751_v24  ;;  %v544_v31 = vpop.f32.mrb[22].mxu1  ;;  %1181 = vrot.lane.b32.xlu1 %v2384_v39, %s2028_s13  ;;  %v2425_v59 = vmul.f32 %v1855_v58, %v1037_v61  ;;  %v1722_v24 = vmul.f32 -1.442695, %v809_v8  ;;  %v1041_v61 = vld [vmem:[%s2342_s12 + $0x30] sm:$0xff] }
 0x128   : > { %v755_v35 = vadd.f32 %v754_v46, %v544_v31  ;;  %v546_v36 = vpop.f32.mrb[23].mxu1  ;;  %1307 = vrot.lane.b32.xlu0 %v2364_v16, %s2029_s14  ;;  %v1857_v12 = vpop.eup %1856  ;;  %1866 = vrcp.f32 %v931_v5 }
 0x129   : > { %v757_v40 = vadd.f32 %v756_v50, %v546_v36  ;;  %1868 = vtanh.f32 %v2437_v20 }
 0x12a   : > { %v2390_v41 = vadd.f32 %v2295_v43, %v755_v35  ;;  %v1859_v17 = vpop.eup %1858  ;;  %1870 = vpow2.f32 %v1722_v24 }
 0x12b   : > { %v2395_v42 = vadd.f32 %v2297_v44, %v757_v40  ;;  %v550_v7 = vpop.f32.mrb[24].mxu1  ;;  %1245 = vrot.lane.b32.xlu1 %v2384_v39, %s2027_s8  ;;  %v1861_v19 = vpop.eup %1860  ;;  %v933_v27 = vadd.f32 1.0, %v1859_v17  ;;  %v1724_v40 = vmul.f32 -1.442695, %v2347_v62  ;;  %v1040_v62 = vld [vmem:[%s2342_s12 + $0x28] sm:$0xff] }
 0x12c   : > { %v761_v45 = vadd.f32 %v760_v54, %v550_v7  ;;  %v552_v46 = vpop.f32.mrb[25].mxu1  ;;  %1095 = vrot.lane.b32.xlu0 %v1851_v52, %s2027_s8  ;;  %v2447_v31 = vmul.f32 %v1861_v19, %v1038_v21  ;;  %v1043_v19 = vld [vmem:[%s2342_s12 + $0x40] sm:$0xff] }
 0x12d   : > { %v763_v50 = vadd.f32 %v2335_v57, %v552_v46  ;;  %1872 = vrcp.f32 %v933_v27 }
 0x12e   : > { %v2403_v53 = vadd.f32 %v2295_v43, %v761_v45  ;;  %1874 = vtanh.f32 %v2382_v30 }
 0x12f   : > { %v2408_v54 = vadd.f32 %v2297_v44, %v763_v50  ;;  %v556_v56 = vpop.f32.mrb[26].mxu1  ;;  %1309 = vrot.lane.b32.xlu1 %v2384_v39, %s2029_s14  ;;  %1876 = vpow2.f32 %v1724_v40  ;;  %v1726_v50 = vmul.f32 -1.442695, %v2361_v14 }
 0x130   : > { %v767_v57 = vadd.f32 %v2349_v1, %v556_v56  ;;  %v558_v63 = vpop.f32.mrb[27].mxu1  ;;  %1183 = vrot.lane.b32.xlu0 %v2425_v59, %s2028_s13 }
 0x131   : > { %v769_v2 = vadd.f32 %v2355_v9, %v558_v63 }
 0x132   : > { %v2419_v6 = vadd.f32 %v2295_v43, %v767_v57  ;;  %v1728_v57 = vmul.f32 -1.442695, %v2378_v28  ;;  %v1730_v28 = vmul.f32 -1.442695, %v2390_v41 }
 0x133   : > { %v2428_v1 = vadd.f32 %v2297_v44, %v769_v2  ;;  %v562_v10 = vpop.f32.mrb[28].mxu1  ;;  %1097 = vrot.lane.b32.xlu1 %v1857_v12, %s2027_s8 }
 0x134   : > { %v773_v9 = vadd.f32 %v2366_v18, %v562_v10  ;;  %v564_v15 = vpop.f32.mrb[29].mxu1  ;;  %1247 = vrot.lane.b32.xlu0 %v2425_v59, %s2027_s8  ;;  %v1042_v10 = vld [vmem:[%s2342_s12 + $0x38] sm:$0xff]  ;;  %v1734_v24 = vmul.f32 -1.442695, %v2419_v6 }
 0x135   : > { %v775_v48 = vadd.f32 %v2369_v22, %v564_v15  ;;  %v1732_v15 = vmul.f32 -1.442695, %v2403_v53 }
 0x136   : > { %v2441_v23 = vadd.f32 %v2295_v43, %v773_v9 }
 0x137   : > { %v2445_v18 = vadd.f32 %v2297_v44, %v775_v48  ;;  %v568_v25 = vpop.f32.mrb[30].mxu1  ;;  %1185 = vrot.lane.b32.xlu1 %v2447_v31, %s2028_s13 }
 0x138   : > { %v779_v29 = vadd.f32 %v778_v33, %v568_v25  ;;  %v570_v22 = vpop.f32.mrb[31].mxu1  ;;  %1311 = vrot.lane.b32.xlu0 %v2425_v59, %s2029_s14  ;;  %v1863_v33 = vpop.eup %1862 }
 0x139   : > { %v781_v11 = vadd.f32 %v780_v38, %v570_v22  ;;  %v1865_v36 = vpop.eup %1864  ;;  %v1044_v22 = vld [vmem:[%s2342_s12 + $0x48] sm:$0xff] }
 0x13a   : > { %v2453_v34 = vadd.f32 %v2295_v43, %v779_v29  ;;  %v1867_v38 = vpop.eup %1866  ;;  %v1039_v43 = vld [vmem:[%s2342_s12 + $0x20] sm:$0xff]  ;;  %v935_v7 = vadd.f32 1.0, %v1865_v36 }
 0x13b   : > { %v2458_v35 = vadd.f32 %v2297_v44, %v781_v11  ;;  %1249 = vrot.lane.b32.xlu1 %v2447_v31, %s2027_s8  ;;  %v2469_v44 = vmul.f32 %v1867_v38, %v1039_v43  ;;  %v1869_v45 = vpop.eup %1868  ;;  %v1736_v11 = vmul.f32 -1.442695, %v2441_v23 }
 0x13c   : > { %1099 = vrot.lane.b32.xlu0 %v1863_v33, %s2027_s8  ;;  %v1871_v46 = vpop.eup %1870  ;;  %1878 = vrcp.f32 %v935_v7  ;;  %v1738_v23 = vmul.f32 -1.442695, %v2453_v34  ;;  %v1045_v7 = vld [vmem:[%s2342_s12 + $0x50] sm:$0xff] }
 0x13d   : > { %v1873_v49 = vpop.eup %1872  ;;  %v937_v52 = vadd.f32 1.0, %v1871_v46  ;;  %1880 = vtanh.f32 %v2395_v42 }
 0x13e   : > { %v2477_v55 = vmul.f32 %v1873_v49, %v1040_v62  ;;  %1882 = vpow2.f32 %v1726_v50  ;;  %v1875_v56 = vpop.eup %1874  ;;  %v1709_v50 = vmul.f32 -1.442695, %v2301_v51  ;;  %v1047_v51 = vld [vmem:[%s2342_s12 + $0x60] sm:$0xff] }
 0x13f   : > { %1313 = vrot.lane.b32.xlu1 %v2447_v31, %s2029_s14  ;;  %1884 = vrcp.f32 %v937_v52  ;;  %v1877_v14 = vpop.eup %1876  ;;  %v1046_v52 = vld [vmem:[%s2342_s12 + $0x58] sm:$0xff] }
 0x140   : > { %1187 = vrot.lane.b32.xlu0 %v2469_v44, %s2028_s13  ;;  %v939_v63 = vadd.f32 1.0, %v1877_v14  ;;  %1886 = vtanh.f32 %v2408_v54 }
 0x141   : > { %1888 = vpow2.f32 %v1728_v57  ;;  %v1711_v57 = vmul.f32 -1.442695, %v2306_v60 }
 0x142   : > { %1890 = vrcp.f32 %v939_v63 }
 0x143   : > { %1101 = vrot.lane.b32.xlu1 %v1869_v45, %s2027_s8  ;;  %1892 = vtanh.f32 %v2428_v1 }
 0x144   : > { %1251 = vrot.lane.b32.xlu0 %v2469_v44, %s2027_s8  ;;  %1894 = vpow2.f32 %v1730_v28 }
 0x146   : > { %v1879_v58 = vpop.eup %1878 }
 0x147   : > { %1189 = vrot.lane.b32.xlu1 %v2477_v55, %s2028_s13  ;;  %v2493_v0 = vmul.f32 %v1879_v58, %v1041_v61  ;;  %v1881_v2 = vpop.eup %1880 }
 0x148   : > { %1315 = vrot.lane.b32.xlu0 %v2469_v44, %s2029_s14  ;;  %v1883_v5 = vpop.eup %1882 }
 0x149   : > { %v1885_v8 = vpop.eup %1884  ;;  %v941_v12 = vadd.f32 1.0, %v1883_v5 }
 0x14a   : > { %v2501_v9 = vmul.f32 %v1885_v8, %v1042_v10  ;;  %v1887_v41 = vpop.eup %1886  ;;  %v1048_v10 = vld [vmem:[%s2342_s12 + $0x68] sm:$0xff] }
 0x14b   : > { %1253 = vrot.lane.b32.xlu1 %v2477_v55, %s2027_s8  ;;  %1896 = vrcp.f32 %v941_v12  ;;  %v1889_v17 = vpop.eup %1888  ;;  %v1713_v12 = vmul.f32 -1.442695, %v2310_v4  ;;  %v1715_v4 = vmul.f32 -1.442695, %v2314_v13 }
 0x14c   : > { %1103 = vrot.lane.b32.xlu0 %v1875_v56, %s2027_s8  ;;  %v1891_v48 = vpop.eup %1890  ;;  %1898 = vpow2.f32 %v1732_v15  ;;  %v943_v21 = vadd.f32 1.0, %v1889_v17  ;;  %v1049_v17 = vld [vmem:[%s2342_s12 + $0x70] sm:$0xff] }
 0x14d   : > { %v2518_v53 = vmul.f32 %v1891_v48, %v1043_v19  ;;  %v1893_v25 = vpop.eup %1892  ;;  %1900 = vtanh.f32 %v2445_v18 }
 0x14e   : > { %v1895_v27 = vpop.eup %1894  ;;  %1902 = vrcp.f32 %v943_v21 }
 0x14f   : > { %1317 = vrot.lane.b32.xlu1 %v2477_v55, %s2029_s14  ;;  %1904 = vpow2.f32 %v1734_v24  ;;  %v945_v6 = vadd.f32 1.0, %v1895_v27  ;;  %v1050_v27 = vld [vmem:[%s2342_s12 + $0x78] sm:$0xff] }
 0x150   : > { %1191 = vrot.lane.b32.xlu0 %v2493_v0, %s2028_s13  ;;  %1906 = vtanh.f32 %v2458_v35 }
 0x151   : > { %1908 = vrcp.f32 %v945_v6 }
 0x152   : > { %1910 = vpow2.f32 %v1736_v11 }
 0x153   : > { %1105 = vrot.lane.b32.xlu1 %v1881_v2, %s2027_s8 }
 0x154   : > { %1255 = vrot.lane.b32.xlu0 %v2493_v0, %s2027_s8 }
 0x155   : > { %v1897_v29 = vpop.eup %1896 }
 0x156   : > { %v2526_v33 = vmul.f32 %v1897_v29, %v1044_v22  ;;  %v1899_v36 = vpop.eup %1898 }
 0x157   : > { %1193 = vrot.lane.b32.xlu1 %v2501_v9, %s2028_s13  ;;  %v1901_v38 = vpop.eup %1900  ;;  %v947_v43 = vadd.f32 1.0, %v1899_v36 }
 0x158   : > { %1319 = vrot.lane.b32.xlu0 %v2493_v0, %s2029_s14  ;;  %v1903_v40 = vpop.eup %1902 }
 0x159   : > { %v1905_v45 = vpop.eup %1904  ;;  %1912 = vrcp.f32 %v947_v43  ;;  %v2542_v46 = vmul.f32 %v1903_v40, %v1045_v7  ;;  %v1717_v43 = vmul.f32 -1.442695, %v2322_v32 }
 0x15a   : > { %1914 = vpow2.f32 %v1738_v23  ;;  %v1907_v49 = vpop.eup %1906  ;;  %v949_v62 = vadd.f32 1.0, %v1905_v45 }
 0x15b   : > { %1257 = vrot.lane.b32.xlu1 %v2501_v9, %s2027_s8  ;;  %v1909_v34 = vpop.eup %1908 }
 0x15c   : > { %1107 = vrot.lane.b32.xlu0 %v1887_v41, %s2027_s8  ;;  %v1911_v56 = vpop.eup %1910  ;;  %1916 = vrcp.f32 %v949_v62  ;;  %v2549_v14 = vmul.f32 %v1909_v34, %v1046_v52 }
 0x15d   : > { %1918 = vpow2.f32 %v1709_v50  ;;  %v951_v58 = vadd.f32 1.0, %v1911_v56  ;;  %v1719_v50 = vmul.f32 -1.442695, %v2329_v47 }
 0x15f   : > { %1321 = vrot.lane.b32.xlu1 %v2501_v9, %s2029_s14  ;;  %1920 = vrcp.f32 %v951_v58 }
 0x160   : > { %1195 = vrot.lane.b32.xlu0 %v2518_v53, %s2028_s13  ;;  %1922 = vpow2.f32 %v1711_v57 }
 0x163   : > { %1109 = vrot.lane.b32.xlu1 %v1893_v25, %s2027_s8  ;;  %v1913_v61 = vpop.eup %1912 }
 0x164   : > { %1259 = vrot.lane.b32.xlu0 %v2518_v53, %s2027_s8  ;;  %v1915_v63 = vpop.eup %1914  ;;  %v2561_v2 = vmul.f32 %v1913_v61, %v1047_v51 }
 0x165   : > { %v953_v5 = vadd.f32 1.0, %v1915_v63 }
 0x166   : > { %v1917_v8 = vpop.eup %1916 }
 0x167   : > { %1197 = vrot.lane.b32.xlu1 %v2526_v33, %s2028_s13  ;;  %v1919_v60 = vpop.eup %1918  ;;  %1924 = vrcp.f32 %v953_v5  ;;  %v2568_v28 = vmul.f32 %v1917_v8, %v1048_v10 }
 0x168   : > { %1323 = vrot.lane.b32.xlu0 %v2518_v53, %s2029_s14  ;;  %v924_v15 = vadd.f32 1.0, %v1919_v60  ;;  %1926 = vpow2.f32 %v1713_v12 }
 0x169   : > { %v1921_v41 = vpop.eup %1920 }
 0x16a   : > { %v1923_v19 = vpop.eup %1922  ;;  %1928 = vrcp.f32 %v924_v15  ;;  %v2580_v21 = vmul.f32 %v1921_v41, %v1049_v17  ;;  %v1721_v41 = vmul.f32 -1.442695, %v2352_v3  ;;  %v1723_v3 = vmul.f32 -1.442695, %v2374_v26 }
 0x16b   : > { %1261 = vrot.lane.b32.xlu1 %v2526_v33, %s2027_s8  ;;  %v926_v24 = vadd.f32 1.0, %v1923_v19  ;;  %1930 = vpow2.f32 %v1715_v4 }
 0x16c   : > { %1111 = vrot.lane.b32.xlu0 %v1901_v38, %s2027_s8 }
 0x16d   : > { %1932 = vrcp.f32 %v926_v24 }
 0x16e   : > { %1934 = vpow2.f32 %v1717_v43 }
 0x16f   : > { %1325 = vrot.lane.b32.xlu1 %v2526_v33, %s2029_s14 }
 0x170   : > { %1199 = vrot.lane.b32.xlu0 %v2542_v46, %s2028_s13 }
 0x171   : > { %v1925_v25 = vpop.eup %1924 }
 0x172   : > { %v2588_v6 = vmul.f32 %v1925_v25, %v1050_v27  ;;  %v1927_v11 = vpop.eup %1926 }
 0x173   : > { %1113 = vrot.lane.b32.xlu1 %v1907_v49, %s2027_s8  ;;  %v928_v40 = vadd.f32 1.0, %v1927_v11 }
 0x174   : > { %1263 = vrot.lane.b32.xlu0 %v2542_v46, %s2027_s8  ;;  %v2596_v36 = vpop.eup %1928 }
 0x175   : > { %v1931_v49 = vpop.eup %1930  ;;  %1936 = vrcp.f32 %v928_v40 }
 0x176   : > { %v930_v58 = vadd.f32 1.0, %v1931_v49  ;;  %1938 = vpow2.f32 %v1719_v50 }
 0x177   : > { %1201 = vrot.lane.b32.xlu1 %v2549_v14, %s2028_s13  ;;  %v2607_v34 = vpop.eup %1932 }
 0x178   : > { %1327 = vrot.lane.b32.xlu0 %v2542_v46, %s2029_s14  ;;  %1940 = vrcp.f32 %v930_v58  ;;  %v1935_v10 = vpop.eup %1934 }
 0x17b   : > { %1265 = vrot.lane.b32.xlu1 %v2549_v14, %s2027_s8 }
 0x17c   : > { %1203 = vrot.lane.b32.xlu0 %v2561_v2, %s2028_s13 }
 0x17e   : > { %v1084_v48 = vpop.permute.xlu0 %1083 }
 0x17f   : > { %1329 = vrot.lane.b32.xlu1 %v2549_v14, %s2029_s14  ;;  %v1131_v23 = vmul.f32 %v2596_v36, %v1084_v48  ;;  %v2624_v12 = vpop.eup %1936  ;;  %v932_v48 = vadd.f32 1.0, %v1935_v10 }
 0x180   : > { %1267 = vrot.lane.b32.xlu0 %v2561_v2, %s2027_s8  ;;  %v1939_v24 = vpop.eup %1938 }
 0x181   : > { %v1147_v62 = vadd.f32 %v1131_v23, %v2364_v16  ;;  %v934_v23 = vadd.f32 1.0, %v1939_v24 }
 0x182   : > { %v1086_v29 = vpop.permute.xlu0 %1085  ;;  %v2633_v27 = vpop.eup %1940 }
 0x183   : > { %1205 = vrot.lane.b32.xlu1 %v2568_v28, %s2028_s13  ;;  %v1132_v52 = vmul.f32 %v2607_v34, %v1086_v29 }
 0x184   : > { %1331 = vrot.lane.b32.xlu0 %v2561_v2, %s2029_s14 }
 0x185   : > { %v1148_v51 = vadd.f32 %v1132_v52, %v2384_v39 }
 0x186   : > { %v1088_v22 = vpop.permute.xlu1 %1087 }
 0x187   : > { %1269 = vrot.lane.b32.xlu1 %v2568_v28, %s2027_s8  ;;  %v1133_v17 = vmul.f32 %v2624_v12, %v1088_v22 }
 0x188   : > { %1207 = vrot.lane.b32.xlu0 %v2580_v21, %s2028_s13 }
 0x189   : > { %v1149_v25 = vadd.f32 %v1133_v17, %v2425_v59 }
 0x18a   : > { %v1090_v38 = vpop.permute.xlu1 %1089 }
 0x18b   : > { %1333 = vrot.lane.b32.xlu1 %v2568_v28, %s2029_s14  ;;  %v1134_v22 = vmul.f32 %v2633_v27, %v1090_v38 }
 0x18c   : > { %1271 = vrot.lane.b32.xlu0 %v2580_v21, %s2027_s8 }
 0x18d   : > { %v1150_v59 = vadd.f32 %v1134_v22, %v2447_v31  ;;  %v1725_v31 = vmul.f32 -1.442695, %v2412_v37 }
 0x18e   : > { %v2594_v13 = vpop.permute.xlu0 %1091 }
 0x18f   : > { %1209 = vrot.lane.b32.xlu1 %v2588_v6, %s2028_s13 }
 0x190   : > { %1335 = vrot.lane.b32.xlu0 %v2580_v21, %s2029_s14 }
 0x192   : > { %v1180_v7 = vpop.permute.xlu0 %1179 }
 0x193   : > { %1273 = vrot.lane.b32.xlu1 %v2588_v6, %s2027_s8  ;;  %v1227_v56 = vadd.f32 %v1180_v7, %v1147_v62 }
 0x195   : > { %v2604_v45 = vpop.permute.xlu1 %1093 }
 0x196   : > { %v1244_v32 = vpop.permute.xlu0 %1243 }
 0x197   : > { %1337 = vrot.lane.b32.xlu1 %v2588_v6, %s2029_s14  ;;  %v1291_v57 = vadd.f32 %v1244_v32, %v1227_v56 }
 0x199   : > { %v1182_v61 = vpop.permute.xlu1 %1181 }
 0x19a   : > { %v1308_v16 = vpop.permute.xlu0 %1307  ;;  %v1228_v5 = vadd.f32 %v1182_v61, %v1148_v51 }
 0x19b   : > { %v1355_v63 = vadd.f32 %v1308_v16, %v1291_v57 }
 0x19d   : > { %v1246_v47 = vpop.permute.xlu1 %1245  ;;  %1942 = vtanh.f32 %v1355_v63  ;;  %1547 = vst.msk [vmem:[%s2617_s16] sm:$0xff] %vm573_vm0, %v1355_v63 }
 0x19e   : > { %v2622_v8 = vpop.permute.xlu0 %1095  ;;  %v1292_v60 = vadd.f32 %v1246_v47, %v1228_v5 }
 0x1a1   : > { %v1310_v15 = vpop.permute.xlu1 %1309 }
 0x1a2   : > { %v1356_v39 = vadd.f32 %v1310_v15, %v1292_v60  ;;  %v1184_v19 = vpop.permute.xlu0 %1183 }
 0x1a3   : > { %v1229_v43 = vadd.f32 %v1184_v19, %v1149_v25 }
 0x1a4   : > { %1944 = vtanh.f32 %v1356_v39  ;;  %1548 = vst.msk [vmem:[%s2617_s16 + $0x8] sm:$0xff] %vm573_vm0, %v1356_v39 }
 0x1a5   : > { %v2630_v4 = vpop.permute.xlu1 %1097  ;;  %1946 = vpow2.f32 %v1721_v41  ;;  %v1727_v41 = vmul.f32 -1.442695, %v2437_v20 }
 0x1a6   : > { %1948 = vrcp.f32 %v932_v48  ;;  %v1248_v29 = vpop.permute.xlu0 %1247 }
 0x1a7   : > { %v1943_v11 = vpop.eup %1942  ;;  %v1293_v7 = vadd.f32 %v1248_v29, %v1229_v43  ;;  %1950 = vpow2.f32 %v1723_v3 }
 0x1a8   : > { %1403 = vrot.lane.b32.xlu0 %v1943_v11, %s2029_s14  ;;  %1952 = vrcp.f32 %v934_v23 }
 0x1a9   : > { %v1186_v40 = vpop.permute.xlu1 %1185 }
 0x1aa   : > { %v1312_v49 = vpop.permute.xlu0 %1311  ;;  %v1230_v52 = vadd.f32 %v1186_v40, %v1150_v59 }
 0x1ab   : > { %v1357_v62 = vadd.f32 %v1312_v49, %v1293_v7 }
 0x1ad   : > { %v1250_v32 = vpop.permute.xlu1 %1249  ;;  %1954 = vtanh.f32 %v1357_v62  ;;  %1549 = vst.msk [vmem:[%s2617_s16 + $0x10] sm:$0xff] %vm573_vm0, %v1357_v62 }
 0x1ae   : > { %v1945_v50 = vpop.eup %1944  ;;  %v2642_v26 = vpop.permute.xlu0 %1099  ;;  %v1294_v56 = vadd.f32 %v1250_v32, %v1230_v52 }
 0x1af   : > { %1405 = vrot.lane.b32.xlu1 %v1945_v50, %s2029_s14  ;;  %v1947_v38 = vpop.eup %1946 }
 0x1b0   : > { %v2644_v58 = vpop.eup %1948  ;;  %v936_v51 = vadd.f32 1.0, %v1947_v38 }
 0x1b1   : > { %v1314_v61 = vpop.permute.xlu1 %1313  ;;  %v1135_v57 = vmul.f32 %v2644_v58, %v2594_v13  ;;  %v1951_v5 = vpop.eup %1950 }
 0x1b2   : > { %v1358_v16 = vadd.f32 %v1314_v61, %v1294_v56  ;;  %v1188_v63 = vpop.permute.xlu0 %1187  ;;  %v2654_v60 = vpop.eup %1952  ;;  %v938_v39 = vadd.f32 1.0, %v1951_v5 }
 0x1b3   : > { %v1151_v10 = vadd.f32 %v1135_v57, %v2469_v44  ;;  %v1136_v13 = vmul.f32 %v2654_v60, %v2604_v45 }
 0x1b4   : > { %1956 = vtanh.f32 %v1358_v16  ;;  %1550 = vst.msk [vmem:[%s2617_s16 + $0x18] sm:$0xff] %vm573_vm0, %v1358_v16 }
 0x1b5   : > { %v2651_v47 = vpop.permute.xlu1 %1101  ;;  %1958 = vpow2.f32 %v1725_v31  ;;  %v1231_v17 = vadd.f32 %v1188_v63, %v1151_v10  ;;  %v1152_v44 = vadd.f32 %v1136_v13, %v2477_v55  ;;  %v1729_v55 = vmul.f32 -1.442695, %v2382_v30 }
 0x1b6   : > { %1960 = vrcp.f32 %v936_v51  ;;  %v1252_v15 = vpop.permute.xlu0 %1251  ;;  %v1731_v30 = vmul.f32 -1.442695, %v2395_v42  ;;  %v1733_v42 = vmul.f32 -1.442695, %v2408_v54 }
 0x1b7   : > { %v1955_v37 = vpop.eup %1954  ;;  %v1295_v19 = vadd.f32 %v1252_v15, %v1231_v17  ;;  %1962 = vpow2.f32 %v1727_v41 }
 0x1b8   : > { %1407 = vrot.lane.b32.xlu0 %v1955_v37, %s2029_s14  ;;  %1964 = vrcp.f32 %v938_v39 }
 0x1b9   : > { %v1190_v48 = vpop.permute.xlu1 %1189 }
 0x1ba   : > { %v1316_v24 = vpop.permute.xlu0 %1315  ;;  %v1232_v20 = vadd.f32 %v1190_v48, %v1152_v44 }
 0x1bb   : > { %v1359_v25 = vadd.f32 %v1316_v24, %v1295_v19  ;;  %v1735_v19 = vmul.f32 -1.442695, %v2428_v1  ;;  %v1737_v1 = vmul.f32 -1.442695, %v2445_v18  ;;  %v1739_v18 = vmul.f32 -1.442695, %v2458_v35 }
 0x1bd   : > { %v1254_v29 = vpop.permute.xlu1 %1253  ;;  %1966 = vtanh.f32 %v1359_v25  ;;  %1551 = vst.msk [vmem:[%s2617_s16 + $0x20] sm:$0xff] %vm573_vm0, %v1359_v25 }
 0x1be   : > { %v1957_v11 = vpop.eup %1956  ;;  %v2664_v45 = vpop.permute.xlu0 %1103  ;;  %v1296_v22 = vadd.f32 %v1254_v29, %v1232_v20 }
 0x1bf   : > { %1409 = vrot.lane.b32.xlu1 %v1957_v11, %s2029_s14  ;;  %v1959_v3 = vpop.eup %1958 }
 0x1c0   : > { %v2666_v43 = vpop.eup %1960  ;;  %v940_v49 = vadd.f32 1.0, %v1959_v3 }
 0x1c1   : > { %v1318_v23 = vpop.permute.xlu1 %1317  ;;  %v1137_v40 = vmul.f32 %v2666_v43, %v2622_v8  ;;  %v1963_v32 = vpop.eup %1962 }
 0x1c2   : > { %v1360_v7 = vadd.f32 %v1318_v23, %v1296_v22  ;;  %v1192_v59 = vpop.permute.xlu0 %1191  ;;  %v2676_v52 = vpop.eup %1964  ;;  %v942_v31 = vadd.f32 1.0, %v1963_v32 }
 0x1c3   : > { %v1153_v50 = vadd.f32 %v1137_v40, %v2493_v0  ;;  %v1138_v8 = vmul.f32 %v2676_v52, %v2630_v4 }
 0x1c4   : > { %1968 = vtanh.f32 %v1360_v7  ;;  %1552 = vst.msk [vmem:[%s2617_s16 + $0x28] sm:$0xff] %vm573_vm0, %v1360_v7 }
 0x1c5   : > { %v2673_v62 = vpop.permute.xlu1 %1105  ;;  %1970 = vpow2.f32 %v1729_v55  ;;  %v1233_v61 = vadd.f32 %v1192_v59, %v1153_v50  ;;  %v1154_v0 = vadd.f32 %v1138_v8, %v2501_v9 }
 0x1c6   : > { %1972 = vrcp.f32 %v940_v49  ;;  %v1256_v38 = vpop.permute.xlu0 %1255 }
 0x1c7   : > { %v1967_v56 = vpop.eup %1966  ;;  %v1297_v16 = vadd.f32 %v1256_v38, %v1233_v61  ;;  %1974 = vpow2.f32 %v1731_v30 }
 0x1c8   : > { %1411 = vrot.lane.b32.xlu0 %v1967_v56, %s2029_s14  ;;  %1976 = vrcp.f32 %v942_v31 }
 0x1c9   : > { %v1194_v57 = vpop.permute.xlu1 %1193 }
 0x1ca   : > { %v1320_v51 = vpop.permute.xlu0 %1319  ;;  %v1234_v15 = vadd.f32 %v1194_v57, %v1154_v0 }
 0x1cb   : > { %v1361_v63 = vadd.f32 %v1320_v51, %v1297_v16 }
 0x1cd   : > { %v1258_v5 = vpop.permute.xlu1 %1257  ;;  %1978 = vtanh.f32 %v1361_v63  ;;  %1553 = vst.msk [vmem:[%s2617_s16 + $0x30] sm:$0xff] %vm573_vm0, %v1361_v63 }
 0x1ce   : > { %v1969_v10 = vpop.eup %1968  ;;  %v2687_v4 = vpop.permute.xlu0 %1107  ;;  %v1298_v41 = vadd.f32 %v1258_v5, %v1234_v15  ;;  %1980 = vpow2.f32 %v1733_v42 }
 0x1cf   : > { %1413 = vrot.lane.b32.xlu1 %v1969_v10, %s2029_s14  ;;  %v1971_v37 = vpop.eup %1970 }
 0x1d0   : > { %v2689_v13 = vpop.eup %1972  ;;  %v944_v39 = vadd.f32 1.0, %v1971_v37 }
 0x1d1   : > { %v1322_v9 = vpop.permute.xlu1 %1321  ;;  %v1139_v54 = vmul.f32 %v2689_v13, %v2642_v26  ;;  %v1975_v24 = vpop.eup %1974 }
 0x1d2   : > { %v1362_v17 = vadd.f32 %v1322_v9, %v1298_v41  ;;  %v1196_v48 = vpop.permute.xlu0 %1195  ;;  %v2699_v29 = vpop.eup %1976  ;;  %v946_v3 = vadd.f32 1.0, %v1975_v24 }
 0x1d3   : > { %v1155_v25 = vadd.f32 %v1139_v54, %v2518_v53  ;;  %v1140_v26 = vmul.f32 %v2699_v29, %v2651_v47 }
 0x1d4   : > { %1982 = vtanh.f32 %v1362_v17  ;;  %1554 = vst.msk [vmem:[%s2617_s16 + $0x38] sm:$0xff] %vm573_vm0, %v1362_v17 }
 0x1d5   : > { %v2696_v44 = vpop.permute.xlu1 %1109  ;;  %1984 = vrcp.f32 %v944_v39  ;;  %v1235_v22 = vadd.f32 %v1196_v48, %v1155_v25  ;;  %v1156_v7 = vadd.f32 %v1140_v26, %v2526_v33 }
 0x1d6   : > { %v1260_v11 = vpop.permute.xlu0 %1259  ;;  %1986 = vpow2.f32 %v1735_v19 }
 0x1d7   : > { %v1979_v20 = vpop.eup %1978  ;;  %v1299_v55 = vadd.f32 %v1260_v11, %v1235_v22  ;;  %1988 = vrcp.f32 %v946_v3 }
 0x1d8   : > { %1415 = vrot.lane.b32.xlu0 %v1979_v20, %s2029_s14  ;;  %v1981_v40 = vpop.eup %1980  ;;  %1990 = vpow2.f32 %v1737_v1 }
 0x1d9   : > { %v1198_v23 = vpop.permute.xlu1 %1197  ;;  %v948_v50 = vadd.f32 1.0, %v1981_v40 }
 0x1da   : > { %v1324_v53 = vpop.permute.xlu0 %1323  ;;  %v1236_v30 = vadd.f32 %v1198_v23, %v1156_v7 }
 0x1db   : > { %v1363_v49 = vadd.f32 %v1324_v53, %v1299_v55 }
 0x1dd   : > { %v1262_v59 = vpop.permute.xlu1 %1261  ;;  %1992 = vtanh.f32 %v1363_v49  ;;  %1555 = vst.msk [vmem:[%s2617_s16 + $0x40] sm:$0xff] %vm573_vm0, %v1363_v49 }
 0x1de   : > { %v1983_v32 = vpop.eup %1982  ;;  %v1112_v47 = vpop.permute.xlu0 %1111  ;;  %v1300_v38 = vadd.f32 %v1262_v59, %v1236_v30  ;;  %1994 = vrcp.f32 %v948_v50 }
 0x1df   : > { %1417 = vrot.lane.b32.xlu1 %v1983_v32, %s2029_s14  ;;  %v2710_v56 = vpop.eup %1984  ;;  %1996 = vpow2.f32 %v1739_v18 }
 0x1e0   : > { %v1987_v33 = vpop.eup %1986  ;;  %v1141_v61 = vmul.f32 %v2710_v56, %v2664_v45 }
 0x1e1   : > { %v1326_v8 = vpop.permute.xlu1 %1325  ;;  %v950_v16 = vadd.f32 1.0, %v1987_v33  ;;  %v2716_v51 = vpop.eup %1988 }
 0x1e2   : > { %v1364_v31 = vadd.f32 %v1326_v8, %v1300_v38  ;;  %v1200_v57 = vpop.permute.xlu0 %1199  ;;  %v1157_v0 = vadd.f32 %v1141_v61, %v2542_v46  ;;  %v1991_v63 = vpop.eup %1990  ;;  %v1142_v10 = vmul.f32 %v2716_v51, %v2673_v62 }
 0x1e3   : > { %v952_v41 = vadd.f32 1.0, %v1991_v63 }
 0x1e4   : > { %1998 = vtanh.f32 %v1364_v31  ;;  %1556 = vst.msk [vmem:[%s2617_s16 + $0x48] sm:$0xff] %vm573_vm0, %v1364_v31  ;;  %v1237_v15 = vadd.f32 %v1200_v57, %v1157_v0  ;;  %v1158_v17 = vadd.f32 %v1142_v10, %v2549_v14 }
 0x1e5   : > { %v1114_v35 = vpop.permute.xlu1 %1113  ;;  %2000 = vrcp.f32 %v950_v16 }
 0x1e6   : > { %v1264_v42 = vpop.permute.xlu0 %1263 }
 0x1e7   : > { %v1993_v5 = vpop.eup %1992  ;;  %v1301_v37 = vadd.f32 %v1264_v42, %v1237_v15 }
 0x1e8   : > { %1419 = vrot.lane.b32.xlu0 %v1993_v5, %s2029_s14  ;;  %v2722_v54 = vpop.eup %1994 }
 0x1e9   : > { %v1202_v45 = vpop.permute.xlu1 %1201  ;;  %v1997_v39 = vpop.eup %1996  ;;  %v1143_v62 = vmul.f32 %v2722_v54, %v2687_v4 }
 0x1ea   : > { %v1328_v9 = vpop.permute.xlu0 %1327  ;;  %v1238_v24 = vadd.f32 %v1202_v45, %v1158_v17  ;;  %v954_v20 = vadd.f32 1.0, %v1997_v39 }
 0x1eb   : > { %v1365_v46 = vadd.f32 %v1328_v9, %v1301_v37  ;;  %v1159_v26 = vadd.f32 %v1143_v62, %v2561_v2 }
 0x1ed   : > { %v1266_v48 = vpop.permute.xlu1 %1265  ;;  %2002 = vtanh.f32 %v1365_v46  ;;  %1557 = vst.msk [vmem:[%s2617_s16 + $0x50] sm:$0xff] %vm573_vm0, %v1365_v46 }
 0x1ee   : > { %v1999_v19 = vpop.eup %1998  ;;  %2004 = vrcp.f32 %v952_v41  ;;  %v1204_v25 = vpop.permute.xlu0 %1203  ;;  %v1302_v11 = vadd.f32 %v1266_v48, %v1238_v24 }
 0x1ef   : > { %1421 = vrot.lane.b32.xlu1 %v1999_v19, %s2029_s14  ;;  %v2731_v22 = vpop.eup %2000  ;;  %v1239_v23 = vadd.f32 %v1204_v25, %v1159_v26 }
 0x1f0   : > { %v1144_v4 = vmul.f32 %v2731_v22, %v2696_v44 }
 0x1f1   : > { %v1330_v3 = vpop.permute.xlu1 %1329 }
 0x1f2   : > { %v1366_v14 = vadd.f32 %v1330_v3, %v1302_v11  ;;  %v1268_v1 = vpop.permute.xlu0 %1267  ;;  %v1160_v49 = vadd.f32 %v1144_v4, %v2568_v28 }
 0x1f3   : > { %v1303_v40 = vadd.f32 %v1268_v1, %v1239_v23 }
 0x1f4   : > { %2006 = vtanh.f32 %v1366_v14  ;;  %1558 = vst.msk [vmem:[%s2617_s16 + $0x58] sm:$0xff] %vm573_vm0, %v1366_v14 }
 0x1f5   : > { %2008 = vrcp.f32 %v954_v20  ;;  %v1206_v55 = vpop.permute.xlu1 %1205 }
 0x1f6   : > { %v1332_v53 = vpop.permute.xlu0 %1331  ;;  %v1240_v50 = vadd.f32 %v1206_v55, %v1160_v49 }
 0x1f7   : > { %v2003_v7 = vpop.eup %2002  ;;  %v1367_v59 = vadd.f32 %v1332_v53, %v1303_v40 }
 0x1f8   : > { %v2738_v2 = vpop.eup %2004  ;;  %1423 = vrot.lane.b32.xlu0 %v2003_v7, %s2029_s14 }
 0x1f9   : > { %v1270_v32 = vpop.permute.xlu1 %1269  ;;  %v1145_v44 = vmul.f32 %v2738_v2, %v1112_v47  ;;  %2010 = vtanh.f32 %v1367_v59  ;;  %1559 = vst.msk [vmem:[%s2617_s16 + $0x60] sm:$0xff] %vm573_vm0, %v1367_v59 }
 0x1fa   : > { %v1208_v30 = vpop.permute.xlu0 %1207  ;;  %v1304_v18 = vadd.f32 %v1270_v32, %v1240_v50 }
 0x1fb   : > { %v1161_v28 = vadd.f32 %v1145_v44, %v2580_v21 }
 0x1fd   : > { %v1334_v38 = vpop.permute.xlu1 %1333  ;;  %v1241_v47 = vadd.f32 %v1208_v30, %v1161_v28 }
 0x1fe   : > { %v2007_v8 = vpop.eup %2006  ;;  %v1368_v33 = vadd.f32 %v1334_v38, %v1304_v18  ;;  %v1272_v31 = vpop.permute.xlu0 %1271 }
 0x1ff   : > { %v2745_v61 = vpop.eup %2008  ;;  %1425 = vrot.lane.b32.xlu1 %v2007_v8, %s2029_s14  ;;  %v1305_v0 = vadd.f32 %v1272_v31, %v1241_v47 }
 0x200   : > { %v1146_v57 = vmul.f32 %v2745_v61, %v1114_v35  ;;  %2012 = vtanh.f32 %v1368_v33  ;;  %1560 = vst.msk [vmem:[%s2617_s16 + $0x68] sm:$0xff] %vm573_vm0, %v1368_v33 }
 0x201   : > { %v1210_v16 = vpop.permute.xlu1 %1209 }
 0x202   : > { %v1336_v63 = vpop.permute.xlu0 %1335  ;;  %v1162_v5 = vadd.f32 %v1146_v57, %v2588_v6 }
 0x203   : > { %v2011_v42 = vpop.eup %2010  ;;  %v1369_v21 = vadd.f32 %v1336_v63, %v1305_v0 }
 0x204   : > { %1427 = vrot.lane.b32.xlu0 %v2011_v42, %s2029_s14  ;;  %v1242_v15 = vadd.f32 %v1210_v16, %v1162_v5 }
 0x205   : > { %v1274_v10 = vpop.permute.xlu1 %1273  ;;  %2014 = vtanh.f32 %v1369_v21  ;;  %1561 = vst.msk [vmem:[%s2617_s16 + $0x70] sm:$0xff] %vm573_vm0, %v1369_v21 }
 0x206   : > { %v1306_v35 = vadd.f32 %v1274_v10, %v1242_v15 }
 0x209   : > { %v1338_v45 = vpop.permute.xlu1 %1337 }
 0x20a   : > { %v2013_v37 = vpop.eup %2012  ;;  %v1370_v41 = vadd.f32 %v1338_v45, %v1306_v35 }
 0x20b   : > { %1429 = vrot.lane.b32.xlu1 %v2013_v37, %s2029_s14 }
 0x20c   : > { %2016 = vtanh.f32 %v1370_v41  ;;  %1562 = vst.msk [vmem:[%s2617_s16 + $0x78] sm:$0xff] %vm573_vm0, %v1370_v41 }
 0x20f   : > { %v2015_v9 = vpop.eup %2014 }
 0x210   : > { %1431 = vrot.lane.b32.xlu0 %v2015_v9, %s2029_s14 }
 0x216   : > { %v2017_v6 = vpop.eup %2016 }
 0x217   : > { %1433 = vrot.lane.b32.xlu1 %v2017_v6, %s2029_s14 }
 0x21a   : > { %v1404_v17 = vpop.permute.xlu0 %1403 }
 0x21b   : > { %v1451_v46 = vmul.f32 %v2596_v36, %v1404_v17 }
 0x21d   : > { %1483 = vrot.lane.b32.xlu0 %v1451_v46, %s2028_s13 }
 0x221   : > { %v1406_v39 = vpop.permute.xlu1 %1405 }
 0x222   : > { %v1452_v48 = vmul.f32 %v2607_v34, %v1406_v39 }
 0x224   : > { %1485 = vrot.lane.b32.xlu1 %v1452_v48, %s2028_s13 }
 0x22a   : > { %v1408_v19 = vpop.permute.xlu0 %1407 }
 0x22b   : > { %v1453_v62 = vmul.f32 %v2624_v12, %v1408_v19 }
 0x22d   : > { %1487 = vrot.lane.b32.xlu0 %v1453_v62, %s2028_s13 }
 0x231   : > { %v1410_v24 = vpop.permute.xlu1 %1409 }
 0x232   : > { %v1454_v25 = vmul.f32 %v2633_v27, %v1410_v24 }
 0x234   : > { %1489 = vrot.lane.b32.xlu1 %v1454_v25, %s2028_s13 }
 0x23a   : > { %v1412_v11 = vpop.permute.xlu0 %1411 }
 0x23b   : > { %v1455_v36 = vmul.f32 %v2644_v58, %v1412_v11 }
 0x23d   : > { %1491 = vrot.lane.b32.xlu0 %v1455_v36, %s2028_s13 }
 0x241   : > { %v1414_v20 = vpop.permute.xlu1 %1413 }
 0x242   : > { %v1456_v34 = vmul.f32 %v2654_v60, %v1414_v20 }
 0x244   : > { %1493 = vrot.lane.b32.xlu1 %v1456_v34, %s2028_s13 }
 0x24a   : > { %v1416_v3 = vpop.permute.xlu0 %1415 }
 0x24b   : > { %v1457_v12 = vmul.f32 %v2666_v43, %v1416_v3 }
 0x24d   : > { %1495 = vrot.lane.b32.xlu0 %v1457_v12, %s2028_s13 }
 0x251   : > { %v1418_v14 = vpop.permute.xlu1 %1417 }
 0x252   : > { %v1458_v27 = vmul.f32 %v2676_v52, %v1418_v14 }
 0x254   : > { %1497 = vrot.lane.b32.xlu1 %v1458_v27, %s2028_s13 }
 0x25a   : > { %v1420_v26 = vpop.permute.xlu0 %1419 }
 0x25b   : > { %v1459_v58 = vmul.f32 %v2689_v13, %v1420_v26 }
 0x25d   : > { %1499 = vrot.lane.b32.xlu0 %v1459_v58, %s2028_s13 }
 0x261   : > { %v1422_v1 = vpop.permute.xlu1 %1421 }
 0x262   : > { %v1460_v60 = vmul.f32 %v2699_v29, %v1422_v1 }
 0x264   : > { %1501 = vrot.lane.b32.xlu1 %v1460_v60, %s2028_s13 }
 0x26a   : > { %v1424_v4 = vpop.permute.xlu0 %1423 }
 0x26b   : > { %v1461_v43 = vmul.f32 %v2710_v56, %v1424_v4 }
 0x26d   : > { %1503 = vrot.lane.b32.xlu0 %v1461_v43, %s2028_s13 }
 0x271   : > { %v1426_v23 = vpop.permute.xlu1 %1425 }
 0x272   : > { %v1462_v52 = vmul.f32 %v2716_v51, %v1426_v23 }
 0x274   : > { %1505 = vrot.lane.b32.xlu1 %v1462_v52, %s2028_s13 }
 0x276   : > { %v1428_v55 = vpop.permute.xlu0 %1427 }
 0x277   : > { %v1463_v13 = vmul.f32 %v2722_v54, %v1428_v55 }
 0x279   : > { %1507 = vrot.lane.b32.xlu0 %v1463_v13, %s2028_s13 }
 0x27d   : > { %v1430_v40 = vpop.permute.xlu1 %1429 }
 0x27e   : > { %v1464_v29 = vmul.f32 %v2731_v22, %v1430_v40 }
 0x280   : > { %1509 = vrot.lane.b32.xlu1 %v1464_v29, %s2028_s13 }
 0x282   : > { %v1432_v53 = vpop.permute.xlu0 %1431 }
 0x283   : > { %v1465_v56 = vmul.f32 %v2738_v2, %v1432_v53 }
 0x285   : > { %1511 = vrot.lane.b32.xlu0 %v1465_v56, %s2028_s13 }
 0x289   : > { %v1434_v7 = vpop.permute.xlu1 %1433 }
 0x28a   : > { %v1466_v51 = vmul.f32 %v2745_v61, %v1434_v7 }
 0x28c   : > { %1513 = vrot.lane.b32.xlu1 %v1466_v51, %s2028_s13 }
 0x28f   : > { %v1484_v54 = vpop.permute.xlu0 %1483 }
 0x290   : > { %1531 = vst.msk [vmem:[%s2796_s19] sm:$0xff] %vm573_vm0, %v1484_v54 }
 0x296   : > { %v1486_v22 = vpop.permute.xlu1 %1485 }
 0x297   : > { %1532 = vst.msk [vmem:[%s2796_s19 + $0x8] sm:$0xff] %vm573_vm0, %v1486_v22 }
 0x29f   : > { %v1488_v49 = vpop.permute.xlu0 %1487 }
 0x2a0   : > { %1533 = vst.msk [vmem:[%s2796_s19 + $0x10] sm:$0xff] %vm573_vm0, %v1488_v49 }
 0x2a6   : > { %v1490_v59 = vpop.permute.xlu1 %1489 }
 0x2a7   : > { %1534 = vst.msk [vmem:[%s2796_s19 + $0x18] sm:$0xff] %vm573_vm0, %v1490_v59 }
 0x2af   : > { %v1492_v2 = vpop.permute.xlu0 %1491 }
 0x2b0   : > { %1535 = vst.msk [vmem:[%s2796_s19 + $0x20] sm:$0xff] %vm573_vm0, %v1492_v2 }
 0x2b6   : > { %v1494_v32 = vpop.permute.xlu1 %1493 }
 0x2b7   : > { %1536 = vst.msk [vmem:[%s2796_s19 + $0x28] sm:$0xff] %vm573_vm0, %v1494_v32 }
 0x2bf   : > { %v1496_v44 = vpop.permute.xlu0 %1495 }
 0x2c0   : > { %1537 = vst.msk [vmem:[%s2796_s19 + $0x30] sm:$0xff] %vm573_vm0, %v1496_v44 }
 0x2c6   : > { %v1498_v50 = vpop.permute.xlu1 %1497 }
 0x2c7   : > { %1538 = vst.msk [vmem:[%s2796_s19 + $0x38] sm:$0xff] %vm573_vm0, %v1498_v50 }
 0x2cf   : > { %v1500_v30 = vpop.permute.xlu0 %1499 }
 0x2d0   : > { %1539 = vst.msk [vmem:[%s2796_s19 + $0x40] sm:$0xff] %vm573_vm0, %v1500_v30 }
 0x2d6   : > { %v1502_v18 = vpop.permute.xlu1 %1501 }
 0x2d7   : > { %1540 = vst.msk [vmem:[%s2796_s19 + $0x48] sm:$0xff] %vm573_vm0, %v1502_v18 }
 0x2df   : > { %v1504_v38 = vpop.permute.xlu0 %1503 }
 0x2e0   : > { %1541 = vst.msk [vmem:[%s2796_s19 + $0x50] sm:$0xff] %vm573_vm0, %v1504_v38 }
 0x2e6   : > { %v1506_v8 = vpop.permute.xlu1 %1505 }
 0x2e7   : > { %1542 = vst.msk [vmem:[%s2796_s19 + $0x58] sm:$0xff] %vm573_vm0, %v1506_v8 }
 0x2eb   : > { %v1508_v33 = vpop.permute.xlu0 %1507 }
 0x2ec   : > { %1543 = vst.msk [vmem:[%s2796_s19 + $0x60] sm:$0xff] %vm573_vm0, %v1508_v33 }
 0x2f2   : > { %v1510_v28 = vpop.permute.xlu1 %1509 }
 0x2f3   : > { %1544 = vst.msk [vmem:[%s2796_s19 + $0x68] sm:$0xff] %vm573_vm0, %v1510_v28 }
 0x2f7   : > { %v1512_v61 = vpop.permute.xlu0 %1511 }
 0x2f8   : > { %1545 = vst.msk [vmem:[%s2796_s19 + $0x70] sm:$0xff] %vm573_vm0, %v1512_v61 }
 0x2fe   : > { %v1514_v31 = vpop.permute.xlu1 %1513 }
 0x2ff   : > { %1546 = vst.msk [vmem:[%s2796_s19 + $0x78] sm:$0xff] %vm573_vm0, %v1514_v31 }
 0x300 PF: > { %s18_s24 = sadd.s32 1, %s2024_s24  }
 0x301   : > { %p15_p4 = scmp.ge.s32.totalorder %s18_s24, 4  }
 0x303   :  { %17 = sbr.rel (!%p15_p4) target bundleno = 1 (0x1), region = 92 }

</bundles_post_ra>
